<compile_context>
chip_gen: v5e
topology: v5e:2x2
jax: 0.10.0
libtpu: 0.0.40
codegen_flags: <defaults>
</compile_context>

<pallas_src>
from functools import lru_cache, partial

import numpy as np
import jax
import jax.numpy as jnp
from jax.experimental import pallas as pl
from jax.experimental.pallas import tpu as pltpu

EPS = 1e-7        # SSSLoss eps
ALPHA = 1.0       # SSSLoss alpha
RATIO = 1.0       # MSSLoss ratio
OVERLAP = 0.75    # SSSLoss overlap
_INV_LN2 = 1.4426950408889634  # log2(x) = ln(x) / ln(2)


def _round_up(x, m):
    return ((x + m - 1) // m) * m


def _vmem_capacity_cap():
    """Per-generation VMEM cap (v5e/v6e 128 MiB, v7x 64 MiB/TC) minus headroom."""
    try:
        cap = int(pltpu.get_tpu_info().vmem_capacity_bytes)
    except Exception:
        cap = 64 << 20  # conservative fallback (v7x per-TensorCore)
    return max(cap - (8 << 20), 16 << 20)


_VMEM_CAP = _vmem_capacity_cap()


# ---------------------------------------------------------------------------
# Single-scale spectral loss kernel:
#   one fused windowed real-DFT bf16 matmul (MXU, f32 acc) + power + |.| sums.
# ---------------------------------------------------------------------------
def _sss_kernel(x_ref, basis_ref, out_ref):
    # x_ref:     (2, TF, K)   stacked [true ; pred] bf16 frame block
    # basis_ref: (K, 2*NB)    window-folded [cos | sin] bf16 basis (zero padded)
    # out_ref:   (8, 2*NB)    per-block partial sums [lin | log], f32
    tf = x_ref.shape[1]
    k = x_ref.shape[2]
    nb = basis_ref.shape[1] // 2

    x = x_ref[...].reshape(2 * tf, k)                             # layout no-op
    ri = jnp.dot(x, basis_ref[...], preferred_element_type=jnp.float32)
    re = ri[:, :nb]
    im = ri[:, nb:]
    s = re * re + im * im                                         # power = 2.0
    s_t = s[:tf]
    s_p = s[tf:]

    lin = jnp.abs(s_p - s_t)
    # two EUP logs instead of a VALU Newton divide; 1/ln2 applied outside.
    logd = jnp.abs(jnp.log(s_t + EPS) - jnp.log(s_p + EPS))

    # (TF, NB) -> (8, NB) partial sums: pure sublane-group VPU adds.
    # Both halves land in one lane-dense output tile -> one output DMA / step.
    out_ref[:, :nb] = lin.reshape(tf // 8, 8, nb).sum(axis=0)
    out_ref[:, nb:] = logd.reshape(tf // 8, 8, nb).sum(axis=0)


def _frame(x, n_fft, hop):
    """torch.stft(center=True, pad_mode='reflect') framing, done as JAX glue."""
    b, _ = x.shape
    pad = n_fft // 2
    xpad = jnp.pad(x, ((0, 0), (pad, pad)), mode="reflect")
    n_frames = 1 + (xpad.shape[1] - n_fft) // hop
    idx = np.arange(n_frames)[:, None] * hop + np.arange(n_fft)[None, :]
    frames = xpad[:, idx]                              # (B, n_frames, n_fft)
    return frames.reshape(b * n_frames, n_fft), n_frames


@lru_cache(maxsize=None)
def _basis_np(n_fft):
    """Host-built window-folded, lane/K-padded real-DFT basis: [win*cos | win*sin]."""
    n_bins = n_fft // 2 + 1
    nb_pad = _round_up(n_bins, 128)
    k_pad = _round_up(max(n_fft, 128), 128)            # K padded -> full MXU-K fill
    n = np.arange(n_fft)
    kk = np.arange(n_bins)
    ang = 2.0 * np.pi * np.outer(n, kk) / n_fft
    win = (0.5 - 0.5 * np.cos(2.0 * np.pi * n / n_fft))[:, None]  # periodic hann
    basis = np.zeros((k_pad, 2 * nb_pad), dtype=np.float32)
    basis[:n_fft, :n_bins] = win * np.cos(ang)
    basis[:n_fft, nb_pad:nb_pad + n_bins] = win * np.sin(ang)
    return basis


def _vmem_bytes(tf, k_pad, nb2, basis_bufs):
    x_blk = 2 * tf * k_pad * 2            # bf16 stacked frame block
    basis = k_pad * nb2 * 2               # bf16 basis
    out_blk = 8 * nb2 * 4
    ri = 2 * tf * nb2 * 4                 # f32 matmul result
    temps = 4 * tf * nb2 * 4              # s / lin / logd / partial-sum temporaries
    return 2 * x_blk + basis_bufs * basis + 2 * out_blk + ri + temps + (2 << 20)


def _pick_tf(rows, k_pad, nb2, basis_bufs, vmem_cap):
    """Frame-tile size: fits VMEM cap, >=2 blocks (v7x megacore), least padding."""
    rows16 = max(16, _round_up(rows, 16))
    half16 = max(16, _round_up((rows + 1) // 2, 16))
    cands = sorted({c for c in (256, 192, 128, 96, 64, rows16, half16)
                    if 16 <= c <= rows16})
    best_tf, best_key = 16, None
    for tf in cands:
        fits = _vmem_bytes(tf, k_pad, nb2, basis_bufs) <= vmem_cap
        rows_p = _round_up(rows, tf)
        blocks = rows_p // tf
        key = (0 if fits else 1,          # must fit the per-generation VMEM cap
               0 if blocks >= 2 else 1,   # >=2 blocks -> both v7x TensorCores busy
               rows_p - rows,             # least zero-row padding waste
               -tf)                       # then largest tf (best MXU M fill)
        if best_key is None or key < best_key:
            best_key, best_tf = key, tf
    return best_tf


def sss_loss(x_true, x_pred, n_fft):
    """SSSLoss.forward: linear L1 + ALPHA * log2 L1 between power spectrograms."""
    hop = int(n_fft * (1 - OVERLAP))
    n_bins = n_fft // 2 + 1
    nb_pad = _round_up(n_bins, 128)
    k_pad = _round_up(max(n_fft, 128), 128)
    b = x_true.shape[0]

    # bf16 frames (f32-accumulated matmul); halves HBM traffic of the gather too.
    ft, n_frames = _frame(x_true.astype(jnp.bfloat16), n_fft, hop)
    fp, _ = _frame(x_pred.astype(jnp.bfloat16), n_fft, hop)
    rows = ft.shape[0]

    basis_bytes = k_pad * 2 * nb_pad * 2          # bf16
    basis_single = basis_bytes > (4 << 20)        # single-buffer only when it matters
    basis_bufs = 1 if basis_single else 2

    tf = _pick_tf(rows, k_pad, 2 * nb_pad, basis_bufs, _VMEM_CAP)
    rows_p = _round_up(rows, tf)
    num_blocks = rows_p // tf

    # Zero-padded rows/cols give S_true == S_pred == 0 -> contribute 0 to both sums.
    pad = ((0, rows_p - rows), (0, k_pad - n_fft))
    ft = jnp.pad(ft, pad)
    fp = jnp.pad(fp, pad)
    x_stack = jnp.stack([ft, fp], axis=0)         # (2, rows_p, k_pad) bf16

    # Constant under jit -> uploaded once per compilation, cached per n_fft.
    basis = jnp.asarray(_basis_np(n_fft), dtype=jnp.bfloat16)

    est = _vmem_bytes(tf, k_pad, 2 * nb_pad, basis_bufs)
    vmem_limit = int(min(max(est, 32 << 20), _VMEM_CAP))

    if basis_single:
        # Loop-invariant operand: one buffer is enough (index_map is constant).
        basis_spec = pl.BlockSpec((k_pad, 2 * nb_pad), lambda i: (0, 0),
                                  pipeline_mode=pl.Buffered(1))
    else:
        basis_spec = pl.BlockSpec((k_pad, 2 * nb_pad), lambda i: (0, 0))

    parts = pl.pallas_call(
        _sss_kernel,
        out_shape=jax.ShapeDtypeStruct((num_blocks * 8, 2 * nb_pad), jnp.float32),
        grid=(num_blocks,),
        in_specs=[
            pl.BlockSpec((2, tf, k_pad), lambda i: (0, i, 0)),
            basis_spec,
        ],
        out_specs=pl.BlockSpec((8, 2 * nb_pad), lambda i: (i, 0)),
        compiler_params=pltpu.CompilerParams(
            dimension_semantics=("parallel",),
            vmem_limit_bytes=vmem_limit,
        ),
    )(x_stack, basis)

    count = b * n_bins * n_frames     # elements of the (B, n_bins, n_frames) spectrogram
    linear_term = jnp.sum(parts[:, :nb_pad]) / count
    log_term = (jnp.sum(parts[:, nb_pad:]) * _INV_LN2) / count
    return linear_term + ALPHA * log_term


# ---------------------------------------------------------------------------
# F0 L1 loss (first-call semantics: iteration = 1 <= 5000 -> mean path).
# Plain jnp: (B, Frame) is tiny; a dedicated pallas_call is pure launch overhead.
# ---------------------------------------------------------------------------
def f0_l1_loss(f0_pred, f0_true):
    # TODO(synk): the PyTorch module carries a mutable `iteration` counter and a
    # Python-level early return; this reproduces the first-call (<=5000) branch
    # and turns the data-dependent early return into a jnp.where select.
    if f0_true.ndim != 3:
        f0_true = f0_true[..., None]
    t = f0_true.astype(jnp.float32)
    p = f0_pred.astype(jnp.float32).reshape(t.shape)
    voiced = jnp.sum(jnp.where(t >= 50.0, 1.0, 0.0))
    mean_l1 = jnp.mean(jnp.abs(jnp.log(t + 0.001) - jnp.log(p + 0.001)))
    return jnp.where(voiced < 10.0, jnp.float32(0.0), mean_l1)


# ---------------------------------------------------------------------------
# HybridLoss.forward (jit-compiled; n_ffts static)
# ---------------------------------------------------------------------------
@partial(jax.jit, static_argnames=("n_ffts",))
def hybrid_loss(y_pred, y_true, f0_pred, f0_true, n_ffts):
    y_pred = y_pred[..., : y_true.shape[-1]]
    min_len = min(y_true.shape[1], y_pred.shape[1])
    xt = y_true[:, -min_len:]
    xp = y_pred[:, -min_len:]

    loss_mss = RATIO * sum(sss_loss(xt, xp, n_fft) for n_fft in n_ffts)
    loss_f0 = f0_l1_loss(f0_pred, f0_true)
    loss = loss_mss + loss_f0
    return loss, (loss_mss, loss_f0)


if __name__ == "__main__":
    key = jax.random.PRNGKey(0)
    k1, k2, k3, k4 = jax.random.split(key, 4)

    B, T = 2, 512          # waveform batch / length
    FRAME = 64             # f0 frames
    n_ffts = (256, 128, 64)  # small multi-scale FFT sizes (static tuple for jit)

    y_pred = jax.random.normal(k1, (B, T), dtype=jnp.float32)
    y_true = jax.random.normal(k2, (B, T), dtype=jnp.float32)
    f0_pred = jax.random.uniform(k3, (B, FRAME, 1), dtype=jnp.float32,
                                 minval=60.0, maxval=400.0)
    f0_true = jax.random.uniform(k4, (B, FRAME, 1), dtype=jnp.float32,
                                 minval=40.0, maxval=400.0)

    loss, (loss_mss, loss_f0) = hybrid_loss(y_pred, y_true, f0_pred, f0_true, n_ffts)
    jax.block_until_ready(loss)
    jax.block_until_ready(loss_mss)
    jax.block_until_ready(loss_f0)
    print("KERNEL_OK")
</pallas_src>

<mosaic_0001>
module attributes {stable_mosaic.version = 11 : i64} {
  func.func @_sss_kernel(%arg0: i32, %arg1: memref<2x16x256xbf16, #tpu.memory_space<vmem>>, %arg2: memref<256x512xbf16, #tpu.memory_space<vmem>>, %arg3: memref<8x512xf32, #tpu.memory_space<vmem>>) attributes {dimension_semantics = [#tpu.dimension_semantics<parallel>], iteration_bounds = array<i64: 2>, scalar_prefetch = 0 : i64, scratch_operands = 0 : i64, tpu.core_type = #tpu.core_type<tc>, window_params = [{transform_indices = @transform_0, window_bounds = array<i64: 2, 16, 256>}, {pipeline_mode = #tpu.pipeline_mode<synchronous>, transform_indices = @transform_1, window_bounds = array<i64: 256, 512>}, {transform_indices = @transform_2, window_bounds = array<i64: 8, 512>}]} {
    %c0 = arith.constant 0 : index
    %c0_0 = arith.constant 0 : index
    %c0_1 = arith.constant 0 : index
    %0 = vector.load %arg1[%c0, %c0_0, %c0_1] : memref<2x16x256xbf16, #tpu.memory_space<vmem>>, vector<2x16x256xbf16>
    %1 = vector.shape_cast %0 : vector<2x16x256xbf16> to vector<32x256xbf16>
    %c0_2 = arith.constant 0 : index
    %c0_3 = arith.constant 0 : index
    %2 = vector.load %arg2[%c0_2, %c0_3] : memref<256x512xbf16, #tpu.memory_space<vmem>>, vector<256x512xbf16>
    %cst = arith.constant dense<0.000000e+00> : vector<32x512xf32>
    %3 = tpu.matmul %1, %2, %cst {dimension_numbers = #tpu.dot_dimension_numbers<[1], [0], [0], [1], [0, 0, 1, 1], [], []>} : vector<32x256xbf16>, vector<256x512xbf16>, vector<32x512xf32> -> vector<32x512xf32>
    %4 = vector.extract_strided_slice %3 {offsets = [0, 0], sizes = [32, 256], strides = [1, 1]} : vector<32x512xf32> to vector<32x256xf32>
    %5 = vector.extract_strided_slice %3 {offsets = [0, 256], sizes = [32, 256], strides = [1, 1]} : vector<32x512xf32> to vector<32x256xf32>
    %6 = arith.mulf %4, %4 : vector<32x256xf32>
    %7 = arith.mulf %5, %5 : vector<32x256xf32>
    %8 = arith.addf %6, %7 : vector<32x256xf32>
    %9 = vector.extract_strided_slice %8 {offsets = [0, 0], sizes = [16, 256], strides = [1, 1]} : vector<32x256xf32> to vector<16x256xf32>
    %10 = vector.extract_strided_slice %8 {offsets = [16, 0], sizes = [16, 256], strides = [1, 1]} : vector<32x256xf32> to vector<16x256xf32>
    %11 = arith.subf %10, %9 : vector<16x256xf32>
    %12 = math.absf %11 : vector<16x256xf32>
    %cst_4 = arith.constant 1.000000e-07 : f32
    %13 = vector.broadcast %cst_4 : f32 to vector<16x256xf32>
    %14 = arith.addf %9, %13 : vector<16x256xf32>
    %15 = math.log %14 : vector<16x256xf32>
    %cst_5 = arith.constant 1.000000e-07 : f32
    %16 = vector.broadcast %cst_5 : f32 to vector<16x256xf32>
    %17 = arith.addf %10, %16 : vector<16x256xf32>
    %18 = math.log %17 : vector<16x256xf32>
    %19 = arith.subf %15, %18 : vector<16x256xf32>
    %20 = math.absf %19 : vector<16x256xf32>
    %21 = vector.shape_cast %12 : vector<16x256xf32> to vector<2x8x256xf32>
    %cst_6 = arith.constant dense<0.000000e+00> : vector<8x256xf32>
    %22 = vector.multi_reduction <add>, %21, %cst_6 [0] : vector<2x8x256xf32> to vector<8x256xf32>
    %c0_7 = arith.constant 0 : index
    %c0_8 = arith.constant 0 : index
    %23 = vector.load %arg3[%c0_7, %c0_8] : memref<8x512xf32, #tpu.memory_space<vmem>>, vector<8x256xf32>
    tpu.vector_store %arg3[%c0_7, %c0_8], %22 {strides = array<i32>} : memref<8x512xf32, #tpu.memory_space<vmem>>, vector<8x256xf32>,
    %24 = vector.shape_cast %20 : vector<16x256xf32> to vector<2x8x256xf32>
    %cst_9 = arith.constant dense<0.000000e+00> : vector<8x256xf32>
    %25 = vector.multi_reduction <add>, %24, %cst_9 [0] : vector<2x8x256xf32> to vector<8x256xf32>
    %c0_10 = arith.constant 0 : index
    %c256 = arith.constant 256 : index
    %26 = vector.load %arg3[%c0_10, %c256] : memref<8x512xf32, #tpu.memory_space<vmem>>, vector<8x256xf32>
    tpu.vector_store %arg3[%c0_10, %c256], %25 {strides = array<i32>} : memref<8x512xf32, #tpu.memory_space<vmem>>, vector<8x256xf32>,
    return
  }
  func.func @transform_0(%arg0: i32) -> (i32, i32, i32) {
    %c0_i32 = arith.constant 0 : i32
    %c0_i32_0 = arith.constant 0 : i32
    %c0_i32_1 = arith.constant 0 : i32
    return %c0_i32, %arg0, %c0_i32_0 : i32, i32, i32
  }
  func.func @transform_1(%arg0: i32) -> (i32, i32) {
    %c0_i32 = arith.constant 0 : i32
    %c0_i32_0 = arith.constant 0 : i32
    %c0_i32_1 = arith.constant 0 : i32
    return %c0_i32, %c0_i32_0 : i32, i32
  }
  func.func @transform_2(%arg0: i32) -> (i32, i32) {
    %c0_i32 = arith.constant 0 : i32
    %c0_i32_0 = arith.constant 0 : i32
    return %arg0, %c0_i32 : i32, i32
  }
}

module attributes {stable_mosaic.version = 11 : i64} {
  func.func @_sss_kernel(%arg0: i32, %arg1: memref<2x32x128xbf16, #tpu.memory_space<vmem>>, %arg2: memref<128x256xbf16, #tpu.memory_space<vmem>>, %arg3: memref<8x256xf32, #tpu.memory_space<vmem>>) attributes {dimension_semantics = [#tpu.dimension_semantics<parallel>], iteration_bounds = array<i64: 2>, scalar_prefetch = 0 : i64, scratch_operands = 0 : i64, tpu.core_type = #tpu.core_type<tc>, window_params = [{transform_indices = @transform_0, window_bounds = array<i64: 2, 32, 128>}, {pipeline_mode = #tpu.pipeline_mode<synchronous>, transform_indices = @transform_1, window_bounds = array<i64: 128, 256>}, {transform_indices = @transform_2, window_bounds = array<i64: 8, 256>}]} {
    %c0 = arith.constant 0 : index
    %c0_0 = arith.constant 0 : index
    %c0_1 = arith.constant 0 : index
    %0 = vector.load %arg1[%c0, %c0_0, %c0_1] : memref<2x32x128xbf16, #tpu.memory_space<vmem>>, vector<2x32x128xbf16>
    %1 = vector.shape_cast %0 : vector<2x32x128xbf16> to vector<64x128xbf16>
    %c0_2 = arith.constant 0 : index
    %c0_3 = arith.constant 0 : index
    %2 = vector.load %arg2[%c0_2, %c0_3] : memref<128x256xbf16, #tpu.memory_space<vmem>>, vector<128x256xbf16>
    %cst = arith.constant dense<0.000000e+00> : vector<64x256xf32>
    %3 = tpu.matmul %1, %2, %cst {dimension_numbers = #tpu.dot_dimension_numbers<[1], [0], [0], [1], [0, 0, 1, 1], [], []>} : vector<64x128xbf16>, vector<128x256xbf16>, vector<64x256xf32> -> vector<64x256xf32>
    %4 = vector.extract_strided_slice %3 {offsets = [0, 0], sizes = [64, 128], strides = [1, 1]} : vector<64x256xf32> to vector<64x128xf32>
    %5 = vector.extract_strided_slice %3 {offsets = [0, 128], sizes = [64, 128], strides = [1, 1]} : vector<64x256xf32> to vector<64x128xf32>
    %6 = arith.mulf %4, %4 : vector<64x128xf32>
    %7 = arith.mulf %5, %5 : vector<64x128xf32>
    %8 = arith.addf %6, %7 : vector<64x128xf32>
    %9 = vector.extract_strided_slice %8 {offsets = [0, 0], sizes = [32, 128], strides = [1, 1]} : vector<64x128xf32> to vector<32x128xf32>
    %10 = vector.extract_strided_slice %8 {offsets = [32, 0], sizes = [32, 128], strides = [1, 1]} : vector<64x128xf32> to vector<32x128xf32>
    %11 = arith.subf %10, %9 : vector<32x128xf32>
    %12 = math.absf %11 : vector<32x128xf32>
    %cst_4 = arith.constant 1.000000e-07 : f32
    %13 = vector.broadcast %cst_4 : f32 to vector<32x128xf32>
    %14 = arith.addf %9, %13 : vector<32x128xf32>
    %15 = math.log %14 : vector<32x128xf32>
    %cst_5 = arith.constant 1.000000e-07 : f32
    %16 = vector.broadcast %cst_5 : f32 to vector<32x128xf32>
    %17 = arith.addf %10, %16 : vector<32x128xf32>
    %18 = math.log %17 : vector<32x128xf32>
    %19 = arith.subf %15, %18 : vector<32x128xf32>
    %20 = math.absf %19 : vector<32x128xf32>
    %21 = vector.shape_cast %12 : vector<32x128xf32> to vector<4x8x128xf32>
    %cst_6 = arith.constant dense<0.000000e+00> : vector<8x128xf32>
    %22 = vector.multi_reduction <add>, %21, %cst_6 [0] : vector<4x8x128xf32> to vector<8x128xf32>
    %c0_7 = arith.constant 0 : index
    %c0_8 = arith.constant 0 : index
    %23 = vector.load %arg3[%c0_7, %c0_8] : memref<8x256xf32, #tpu.memory_space<vmem>>, vector<8x128xf32>
    tpu.vector_store %arg3[%c0_7, %c0_8], %22 {strides = array<i32>} : memref<8x256xf32, #tpu.memory_space<vmem>>, vector<8x128xf32>,
    %24 = vector.shape_cast %20 : vector<32x128xf32> to vector<4x8x128xf32>
    %cst_9 = arith.constant dense<0.000000e+00> : vector<8x128xf32>
    %25 = vector.multi_reduction <add>, %24, %cst_9 [0] : vector<4x8x128xf32> to vector<8x128xf32>
    %c0_10 = arith.constant 0 : index
    %c128 = arith.constant 128 : index
    %26 = vector.load %arg3[%c0_10, %c128] : memref<8x256xf32, #tpu.memory_space<vmem>>, vector<8x128xf32>
    tpu.vector_store %arg3[%c0_10, %c128], %25 {strides = array<i32>} : memref<8x256xf32, #tpu.memory_space<vmem>>, vector<8x128xf32>,
    return
  }
  func.func @transform_0(%arg0: i32) -> (i32, i32, i32) {
    %c0_i32 = arith.constant 0 : i32
    %c0_i32_0 = arith.constant 0 : i32
    %c0_i32_1 = arith.constant 0 : i32
    return %c0_i32, %arg0, %c0_i32_0 : i32, i32, i32
  }
  func.func @transform_1(%arg0: i32) -> (i32, i32) {
    %c0_i32 = arith.constant 0 : i32
    %c0_i32_0 = arith.constant 0 : i32
    %c0_i32_1 = arith.constant 0 : i32
    return %c0_i32, %c0_i32_0 : i32, i32
  }
  func.func @transform_2(%arg0: i32) -> (i32, i32) {
    %c0_i32 = arith.constant 0 : i32
    %c0_i32_0 = arith.constant 0 : i32
    return %arg0, %c0_i32 : i32, i32
  }
}

module attributes {stable_mosaic.version = 11 : i64} {
  func.func @_sss_kernel(%arg0: i32, %arg1: memref<2x48x128xbf16, #tpu.memory_space<vmem>>, %arg2: memref<128x256xbf16, #tpu.memory_space<vmem>>, %arg3: memref<8x256xf32, #tpu.memory_space<vmem>>) attributes {dimension_semantics = [#tpu.dimension_semantics<parallel>], iteration_bounds = array<i64: 2>, scalar_prefetch = 0 : i64, scratch_operands = 0 : i64, tpu.core_type = #tpu.core_type<tc>, window_params = [{transform_indices = @transform_0, window_bounds = array<i64: 2, 48, 128>}, {pipeline_mode = #tpu.pipeline_mode<synchronous>, transform_indices = @transform_1, window_bounds = array<i64: 128, 256>}, {transform_indices = @transform_2, window_bounds = array<i64: 8, 256>}]} {
    %c0 = arith.constant 0 : index
    %c0_0 = arith.constant 0 : index
    %c0_1 = arith.constant 0 : index
    %0 = vector.load %arg1[%c0, %c0_0, %c0_1] : memref<2x48x128xbf16, #tpu.memory_space<vmem>>, vector<2x48x128xbf16>
    %1 = vector.shape_cast %0 : vector<2x48x128xbf16> to vector<96x128xbf16>
    %c0_2 = arith.constant 0 : index
    %c0_3 = arith.constant 0 : index
    %2 = vector.load %arg2[%c0_2, %c0_3] : memref<128x256xbf16, #tpu.memory_space<vmem>>, vector<128x256xbf16>
    %cst = arith.constant dense<0.000000e+00> : vector<96x256xf32>
    %3 = tpu.matmul %1, %2, %cst {dimension_numbers = #tpu.dot_dimension_numbers<[1], [0], [0], [1], [0, 0, 1, 1], [], []>} : vector<96x128xbf16>, vector<128x256xbf16>, vector<96x256xf32> -> vector<96x256xf32>
    %4 = vector.extract_strided_slice %3 {offsets = [0, 0], sizes = [96, 128], strides = [1, 1]} : vector<96x256xf32> to vector<96x128xf32>
    %5 = vector.extract_strided_slice %3 {offsets = [0, 128], sizes = [96, 128], strides = [1, 1]} : vector<96x256xf32> to vector<96x128xf32>
    %6 = arith.mulf %4, %4 : vector<96x128xf32>
    %7 = arith.mulf %5, %5 : vector<96x128xf32>
    %8 = arith.addf %6, %7 : vector<96x128xf32>
    %9 = vector.extract_strided_slice %8 {offsets = [0, 0], sizes = [48, 128], strides = [1, 1]} : vector<96x128xf32> to vector<48x128xf32>
    %10 = vector.extract_strided_slice %8 {offsets = [48, 0], sizes = [48, 128], strides = [1, 1]} : vector<96x128xf32> to vector<48x128xf32>
    %11 = arith.subf %10, %9 : vector<48x128xf32>
    %12 = math.absf %11 : vector<48x128xf32>
    %cst_4 = arith.constant 1.000000e-07 : f32
    %13 = vector.broadcast %cst_4 : f32 to vector<48x128xf32>
    %14 = arith.addf %9, %13 : vector<48x128xf32>
    %15 = math.log %14 : vector<48x128xf32>
    %cst_5 = arith.constant 1.000000e-07 : f32
    %16 = vector.broadcast %cst_5 : f32 to vector<48x128xf32>
    %17 = arith.addf %10, %16 : vector<48x128xf32>
    %18 = math.log %17 : vector<48x128xf32>
    %19 = arith.subf %15, %18 : vector<48x128xf32>
    %20 = math.absf %19 : vector<48x128xf32>
    %21 = vector.shape_cast %12 : vector<48x128xf32> to vector<6x8x128xf32>
    %cst_6 = arith.constant dense<0.000000e+00> : vector<8x128xf32>
    %22 = vector.multi_reduction <add>, %21, %cst_6 [0] : vector<6x8x128xf32> to vector<8x128xf32>
    %c0_7 = arith.constant 0 : index
    %c0_8 = arith.constant 0 : index
    %23 = vector.load %arg3[%c0_7, %c0_8] : memref<8x256xf32, #tpu.memory_space<vmem>>, vector<8x128xf32>
    tpu.vector_store %arg3[%c0_7, %c0_8], %22 {strides = array<i32>} : memref<8x256xf32, #tpu.memory_space<vmem>>, vector<8x128xf32>,
    %24 = vector.shape_cast %20 : vector<48x128xf32> to vector<6x8x128xf32>
    %cst_9 = arith.constant dense<0.000000e+00> : vector<8x128xf32>
    %25 = vector.multi_reduction <add>, %24, %cst_9 [0] : vector<6x8x128xf32> to vector<8x128xf32>
    %c0_10 = arith.constant 0 : index
    %c128 = arith.constant 128 : index
    %26 = vector.load %arg3[%c0_10, %c128] : memref<8x256xf32, #tpu.memory_space<vmem>>, vector<8x128xf32>
    tpu.vector_store %arg3[%c0_10, %c128], %25 {strides = array<i32>} : memref<8x256xf32, #tpu.memory_space<vmem>>, vector<8x128xf32>,
    return
  }
  func.func @transform_0(%arg0: i32) -> (i32, i32, i32) {
    %c0_i32 = arith.constant 0 : i32
    %c0_i32_0 = arith.constant 0 : i32
    %c0_i32_1 = arith.constant 0 : i32
    return %c0_i32, %arg0, %c0_i32_0 : i32, i32, i32
  }
  func.func @transform_1(%arg0: i32) -> (i32, i32) {
    %c0_i32 = arith.constant 0 : i32
    %c0_i32_0 = arith.constant 0 : i32
    %c0_i32_1 = arith.constant 0 : i32
    return %c0_i32, %c0_i32_0 : i32, i32
  }
  func.func @transform_2(%arg0: i32) -> (i32, i32) {
    %c0_i32 = arith.constant 0 : i32
    %c0_i32_0 = arith.constant 0 : i32
    return %arg0, %c0_i32 : i32, i32
  }
}

</mosaic_0001>

<bundles_post_ra>
// kernel: hybrid_loss.3
= control target key start
LH: loop header
LB: loop body
LE: loop exit
PB: predicated region body
PF: predicated region fallthrough
CT: control target
= control target key end

     0   :  { %s1323_s9 = smov 0   ;;  %s1325_s10 = smov 0   ;;  %s1807_s0 = inlined_call_operand.vmem [shape: bf16[2,32,256], index: 0, kind: input, shape index: {}]   ;;  %s1808_s1 = inlined_call_operand.vmem [shape: bf16[256,512], index: 1, kind: input, shape index: {}]   ;;  %s1809_s2 = inlined_call_operand.vmem [shape: f32[16,512], index: 2, kind: output, shape index: {}]  }
   0x1   :  { %s1327_s11 = smov 0  }
   0x2 LB: > { %s887_s12 = sadd.s32 4294967295, %s1306_s11   ;;  %s1340_s13 = sadd.s32 1, %s1306_s11   ;;  %s1306_s11 = sphi %s1327_s11, %s1813_s11   ;;  %s1302_s10 = sphi %s1325_s10, %s1812_s10   ;;  %s1298_s9 = sphi %s1323_s9, %s1811_s9  }
   0x3   : > { %s16_s14 = ssub.s32 %s1306_s11, %s1340_s13  ;;  %s19_s15 = sadd.s32 1, %s1302_s10 }
   0x4   : > { %p17_p0 = scmp.eq.s32.totalorder %s16_s14, 0  ;;  %p26_p1 = scmp.ne.s32.totalorder %s1302_s10, %s1298_s9 }
   0x5   : > { %p27_p2 = scmp.eq.s32.totalorder %s1306_s11, 0  ;;  %p890_p4 = scmp.ge.s32.totalorder %s1306_s11, 2 }
   0x6   : > { %s1349_s16 = scalar_select %p17_p0, %s1302_s10, %s19_s15  }
   0x7   : > { %p28_p3 = por %p27_p2, %p26_p1  ;;  %102 = sbr.rel (%p890_p4) target bundleno = 20 (0x14), region = 20 }
   0xc   : > { %105 = sbr.rel (!%p28_p3) target bundleno = 20 (0x14), region = 24  ;;  %s107_s17 = sand.u32 (%p28_p3), 1, %s1302_s10  }
   0xd   : > { %s1174_s18 = sshll.u32 (%p28_p3), %s1306_s11, 4  ;;  %s891_s19 = sshll.u32 (%p28_p3), %s107_s17, 5 }
   0xe   : > { %s113_s22 = scalar_lea.vmem (%p28_p3), %s1807_s0, %s1174_s18  ;;  %s109_s23 = scalar_lea.vmem (%p28_p3), [#allocation2], %s891_s19 }
   0xf   : > { %v148_v0 = vld [vmem:[%s113_s22] sm:$0xff] (%p28_p3)  ;;  %v150_v1 = vld [vmem:[%s113_s22 + $0x8] sm:$0xff] (%p28_p3) }
  0x10   : > { %v152_v2 = vld [vmem:[%s113_s22 + $0x20] sm:$0xff] (%p28_p3)  ;;  %149 = vst [vmem:[%s109_s23] sm:$0xff] (%p28_p3), %v148_v0  ;;  %v154_v3 = vld [vmem:[%s113_s22 + $0x28] sm:$0xff] (%p28_p3) }
  0x11   : > { %151 = vst [vmem:[%s109_s23 + $0x8] sm:$0xff] %v150_v1 }
  0x12   : > { %153 = vst [vmem:[%s109_s23 + $0x10] sm:$0xff] %v152_v2 }
  0x13   : > { %155 = vst [vmem:[%s109_s23 + $0x18] sm:$0xff] %v154_v3 }
  0x14 PF: > { %p895_p5 = scmp.ge.s32.totalorder %s1306_s11, 1  ;;  %p160_p6 = scmp.lt.s32.totalorder %s1306_s11, 3 }
  0x16   : > { %p161_p7 = pnand %p895_p5, %p160_p6 }
  0x17   : > { %s167_s22 = sand.u32 (!%p161_p7), 1, %s1298_s9   ;;  %p1780_p8 = scmp.lt.s32.totalorder (!%p161_p7), %s887_s12, 1 }
  0x18   : > { %164 = sbr.rel (%p161_p7) target bundleno = 277 (0x115), region = 62  ;;  %s896_s27 = sshll.u32 (!%p161_p7), %s167_s22, 5 }
  0x19   : > { %s1561_s28 = scalar_lea.vmem (!%p161_p7), [#allocation2], %s896_s27 }
  0x1d   : > { %v1029_v4 = vld [vmem:[%s1808_s1 + $0xe0] sm:$0xf]  ;;  %v1210_v5 = vld [vmem:[%s1808_s1 + $0xec] sm:$0xf0]  ;;  %v1208_v9 = vld [vmem:[%s1808_s1 + $0xe4] sm:$0xf] }
  0x1e   : > { %v1157_v6 = vld [vmem:[%s1808_s1 + $0x1e0] sm:$0xf]  ;;  %v1030_v7 = vor.u32 %v1210_v5, %v1029_v4  ;;  %v1242_v8 = vld [vmem:[%s1808_s1 + $0x1ec] sm:$0xf0]  ;;  %v1031_v10 = vld [vmem:[%s1808_s1 + $0xf0] sm:$0xf0] }
  0x1f   : > { %v1158_v11 = vor.u32 %v1242_v8, %v1157_v6  ;;  %v1034_v12 = vor.u32 %v1208_v9, %v1031_v10  ;;  %v1240_v13 = vld [vmem:[%s1808_s1 + $0x1e4] sm:$0xf]  ;;  %v1159_v14 = vld [vmem:[%s1808_s1 + $0x1f0] sm:$0xf0]  ;;  %v1013_v15 = vld [vmem:[%s1808_s1 + $0xc0] sm:$0xf] }
  0x20   : > { %602 = vmatpush.bf16.msra.mxu0 %v1030_v7  ;;  %v1162_v16 = vor.u32 %v1240_v13, %v1159_v14  ;;  %v1206_v17 = vld [vmem:[%s1808_s1 + $0xcc] sm:$0xf0]  ;;  %v1141_v18 = vld [vmem:[%s1808_s1 + $0x1c0] sm:$0xf]  ;;  %v1204_v22 = vld [vmem:[%s1808_s1 + $0xc4] sm:$0xf] }
  0x21   : > { %v1238_v19 = vld [vmem:[%s1808_s1 + $0x1cc] sm:$0xf0]  ;;  %621 = vmatpush.bf16.msra.mxu1 %v1158_v11  ;;  %640 = vmatpush.bf16.msra.mxu2 %v1034_v12  ;;  %v1014_v20 = vor.u32 %v1206_v17, %v1013_v15  ;;  %v1015_v23 = vld [vmem:[%s1808_s1 + $0xd0] sm:$0xf0]  ;;  %v1236_v24 = vld [vmem:[%s1808_s1 + $0x1c4] sm:$0xf] }
  0x22   : > { %v1142_v21 = vor.u32 %v1238_v19, %v1141_v18  ;;  %659 = vmatpush.bf16.msra.mxu3 %v1162_v16  ;;  %v1018_v25 = vor.u32 %v1204_v22, %v1015_v23  ;;  %v1143_v26 = vld [vmem:[%s1808_s1 + $0x1d0] sm:$0xf0]  ;;  %v997_v27 = vld [vmem:[%s1808_s1 + $0xa0] sm:$0xf]  ;;  %v1202_v28 = vld [vmem:[%s1808_s1 + $0xac] sm:$0xf0] }
  0x23   : > { %v1146_v29 = vor.u32 %v1236_v24, %v1143_v26  ;;  %v1125_v30 = vld [vmem:[%s1808_s1 + $0x1a0] sm:$0xf]  ;;  %v1234_v31 = vld [vmem:[%s1808_s1 + $0x1ac] sm:$0xf0]  ;;  %v1200_v32 = vld [vmem:[%s1808_s1 + $0xa4] sm:$0xf]  ;;  %v998_v33 = vor.u32 %v1202_v28, %v997_v27 }
  0x24   : > { %603 = vmatpush.bf16.msra.mxu0 %v1014_v20  ;;  %v999_v34 = vld [vmem:[%s1808_s1 + $0xb0] sm:$0xf0]  ;;  %v1232_v35 = vld [vmem:[%s1808_s1 + $0x1a4] sm:$0xf]  ;;  %v1126_v37 = vor.u32 %v1234_v31, %v1125_v30  ;;  %v981_v39 = vld [vmem:[%s1808_s1 + $0x80] sm:$0xf] }
  0x25   : > { %v1127_v36 = vld [vmem:[%s1808_s1 + $0x1b0] sm:$0xf0]  ;;  %622 = vmatpush.bf16.msra.mxu1 %v1142_v21  ;;  %641 = vmatpush.bf16.msra.mxu2 %v1018_v25  ;;  %v1002_v38 = vor.u32 %v1200_v32, %v999_v34  ;;  %v1198_v40 = vld [vmem:[%s1808_s1 + $0x8c] sm:$0xf0]  ;;  %v1109_v41 = vld [vmem:[%s1808_s1 + $0x180] sm:$0xf] }
  0x26   : > { %660 = vmatpush.bf16.msra.mxu3 %v1146_v29  ;;  %v1130_v42 = vor.u32 %v1232_v35, %v1127_v36  ;;  %v1230_v43 = vld [vmem:[%s1808_s1 + $0x18c] sm:$0xf0]  ;;  %v1196_v44 = vld [vmem:[%s1808_s1 + $0x84] sm:$0xf]  ;;  %v983_v45 = vld [vmem:[%s1808_s1 + $0x90] sm:$0xf0]  ;;  %v982_v48 = vor.u32 %v1198_v40, %v981_v39 }
  0x27   : > { %v1228_v46 = vld [vmem:[%s1808_s1 + $0x184] sm:$0xf]  ;;  %v1111_v47 = vld [vmem:[%s1808_s1 + $0x190] sm:$0xf0]  ;;  %v1110_v49 = vor.u32 %v1230_v43, %v1109_v41  ;;  %v986_v50 = vor.u32 %v1196_v44, %v983_v45  ;;  %v965_v51 = vld [vmem:[%s1808_s1 + $0x60] sm:$0xf] }
  0x28   : > { %604 = vmatpush.bf16.msra.mxu0 %v998_v33  ;;  %v1194_v52 = vld [vmem:[%s1808_s1 + $0x6c] sm:$0xf0]  ;;  %v1093_v53 = vld [vmem:[%s1808_s1 + $0x160] sm:$0xf]  ;;  %v1114_v54 = vor.u32 %v1228_v46, %v1111_v47  ;;  %v1192_v56 = vld [vmem:[%s1808_s1 + $0x64] sm:$0xf] }
  0x29   : > { %623 = vmatpush.bf16.msra.mxu1 %v1126_v37  ;;  %642 = vmatpush.bf16.msra.mxu2 %v1002_v38  ;;  %v1226_v55 = vld [vmem:[%s1808_s1 + $0x16c] sm:$0xf0]  ;;  %v967_v57 = vld [vmem:[%s1808_s1 + $0x70] sm:$0xf0]  ;;  %v1224_v58 = vld [vmem:[%s1808_s1 + $0x164] sm:$0xf]  ;;  %v966_v60 = vor.u32 %v1194_v52, %v965_v51 }
  0x2a   : > { %661 = vmatpush.bf16.msra.mxu3 %v1130_v42  ;;  %v1095_v59 = vld [vmem:[%s1808_s1 + $0x170] sm:$0xf0]  ;;  %v1094_v61 = vor.u32 %v1226_v55, %v1093_v53  ;;  %v970_v62 = vor.u32 %v1192_v56, %v967_v57  ;;  %v949_v63 = vld [vmem:[%s1808_s1 + $0x40] sm:$0xf]  ;;  %v1190_v0 = vld [vmem:[%s1808_s1 + $0x4c] sm:$0xf0] }
  0x2b   : > { %v1077_v1 = vld [vmem:[%s1808_s1 + $0x140] sm:$0xf]  ;;  %v1098_v2 = vor.u32 %v1224_v58, %v1095_v59  ;;  %v1222_v3 = vld [vmem:[%s1808_s1 + $0x14c] sm:$0xf0]  ;;  %v1188_v4 = vld [vmem:[%s1808_s1 + $0x44] sm:$0xf]  ;;  %v950_v8 = vor.u32 %v1190_v0, %v949_v63 }
  0x2c   : > { %605 = vmatpush.bf16.msra.mxu0 %v982_v48  ;;  %v951_v5 = vld [vmem:[%s1808_s1 + $0x50] sm:$0xf0]  ;;  %v1220_v6 = vld [vmem:[%s1808_s1 + $0x144] sm:$0xf]  ;;  %v933_v9 = vld [vmem:[%s1808_s1 + $0x20] sm:$0xf]  ;;  %v1078_v10 = vor.u32 %v1222_v3, %v1077_v1 }
  0x2d   : > { %624 = vmatpush.bf16.msra.mxu1 %v1110_v49  ;;  %643 = vmatpush.bf16.msra.mxu2 %v986_v50  ;;  %v1079_v7 = vld [vmem:[%s1808_s1 + $0x150] sm:$0xf0]  ;;  %v954_v11 = vor.u32 %v1188_v4, %v951_v5  ;;  %v1186_v12 = vld [vmem:[%s1808_s1 + $0x2c] sm:$0xf0]  ;;  %v1061_v13 = vld [vmem:[%s1808_s1 + $0x120] sm:$0xf] }
  0x2e   : > { %662 = vmatpush.bf16.msra.mxu3 %v1114_v54  ;;  %v1218_v14 = vld [vmem:[%s1808_s1 + $0x12c] sm:$0xf0]  ;;  %v1082_v15 = vor.u32 %v1220_v6, %v1079_v7  ;;  %v1184_v16 = vld [vmem:[%s1808_s1 + $0x24] sm:$0xf]  ;;  %v935_v17 = vld [vmem:[%s1808_s1 + $0x30] sm:$0xf0]  ;;  %v934_v20 = vor.u32 %v1186_v12, %v933_v9 }
  0x2f   : > { %v1216_v18 = vld [vmem:[%s1808_s1 + $0x124] sm:$0xf]  ;;  %v1063_v19 = vld [vmem:[%s1808_s1 + $0x130] sm:$0xf0]  ;;  %v917_v21 = vld [vmem:[%s1808_s1] sm:$0xf]  ;;  %v1062_v24 = vor.u32 %v1218_v14, %v1061_v13  ;;  %v938_v25 = vor.u32 %v1184_v16, %v935_v17 }
  0x30   : > { %606 = vmatpush.bf16.msra.mxu0 %v966_v60  ;;  %v1182_v22 = vld [vmem:[%s1808_s1 + $0xc] sm:$0xf0]  ;;  %v1045_v23 = vld [vmem:[%s1808_s1 + $0x100] sm:$0xf]  ;;  %v1180_v27 = vld [vmem:[%s1808_s1 + $0x4] sm:$0xf]  ;;  %v1066_v28 = vor.u32 %v1216_v18, %v1063_v19 }
  0x31   : > { %625 = vmatpush.bf16.msra.mxu1 %v1094_v61  ;;  %644 = vmatpush.bf16.msra.mxu2 %v970_v62  ;;  %v1214_v26 = vld [vmem:[%s1808_s1 + $0x10c] sm:$0xf0]  ;;  %v919_v29 = vld [vmem:[%s1808_s1 + $0x10] sm:$0xf0]  ;;  %v1212_v30 = vld [vmem:[%s1808_s1 + $0x104] sm:$0xf]  ;;  %v918_v35 = vor.u32 %v1182_v22, %v917_v21 }
  0x32   : > { %663 = vmatpush.bf16.msra.mxu3 %v1098_v2  ;;  %v1047_v31 = vld [vmem:[%s1808_s1 + $0x110] sm:$0xf0]  ;;  %v1209_v32 = vld [vmem:[%s1808_s1 + $0xec] sm:$0xf]  ;;  %v1039_v33 = vld [vmem:[%s1808_s1 + $0xf8] sm:$0xf0]  ;;  %v1046_v39 = vor.u32 %v1214_v26, %v1045_v23  ;;  %v922_v40 = vor.u32 %v1180_v27, %v919_v29 }
  0x33   : > { %v1241_v34 = vld [vmem:[%s1808_s1 + $0x1ec] sm:$0xf]  ;;  %v901_v36 = vld [vmem:[%s1561_s28] sm:$0xf]  ;;  %v1177_v37 = vld [vmem:[%s1561_s28 + $0x4] sm:$0xf0]  ;;  %v1050_v43 = vor.u32 %v1212_v30, %v1047_v31  ;;  %v1042_v44 = vor.u32 %v1209_v32, %v1039_v33 }
  0x34   : > { %607 = vmatpush.bf16.msra.mxu0 %v950_v8  ;;  %v1167_v38 = vld [vmem:[%s1808_s1 + $0x1f8] sm:$0xf0]  ;;  %v1176_v41 = vld [vmem:[%s1561_s28 + $0x4] sm:$0xf]  ;;  %v903_v42 = vld [vmem:[%s1561_s28 + $0x8] sm:$0xf0]  ;;  %v1579_v48 = vor.u32 %v1177_v37, %v901_v36 }
  0x35   : > { %626 = vmatpush.bf16.msra.mxu1 %v1078_v10  ;;  %645 = vmatpush.bf16.msra.mxu2 %v954_v11  ;;  %v1037_v45 = vld [vmem:[%s1808_s1 + $0xe8] sm:$0xf]  ;;  %v1211_v46 = vld [vmem:[%s1808_s1 + $0xf4] sm:$0xf0]  ;;  %v1170_v49 = vor.u32 %v1241_v34, %v1167_v38  ;;  %v1205_v51 = vld [vmem:[%s1808_s1 + $0xcc] sm:$0xf]  ;;  %v1590_v53 = vor.u32 %v1176_v41, %v903_v42 }
  0x36   : > { %664 = vmatpush.bf16.msra.mxu3 %v1082_v15  ;;  %v1165_v47 = vld [vmem:[%s1808_s1 + $0x1e8] sm:$0xf]  ;;  %v1243_v50 = vld [vmem:[%s1808_s1 + $0x1f4] sm:$0xf0]  ;;  %v1023_v52 = vld [vmem:[%s1808_s1 + $0xd8] sm:$0xf0]  ;;  %v1038_v56 = vor.u32 %v1211_v46, %v1037_v45 }
  0x37   : > { %v1237_v54 = vld [vmem:[%s1808_s1 + $0x1cc] sm:$0xf]  ;;  %v1151_v55 = vld [vmem:[%s1808_s1 + $0x1d8] sm:$0xf0]  ;;  %v1166_v57 = vor.u32 %v1243_v50, %v1165_v47  ;;  %v1026_v58 = vor.u32 %v1205_v51, %v1023_v52  ;;  %v1021_v59 = vld [vmem:[%s1808_s1 + $0xc8] sm:$0xf] }
  0x38   : > { %608 = vmatpush.bf16.msra.mxu0 %v934_v20  ;;  %v1207_v60 = vld [vmem:[%s1808_s1 + $0xd4] sm:$0xf0]  ;;  %v1149_v61 = vld [vmem:[%s1808_s1 + $0x1c8] sm:$0xf]  ;;  %v1154_v62 = vor.u32 %v1237_v54, %v1151_v55  ;;  %v1201_v0 = vld [vmem:[%s1808_s1 + $0xac] sm:$0xf] }
  0x39   : > { %627 = vmatpush.bf16.msra.mxu1 %v1062_v24  ;;  %646 = vmatpush.bf16.msra.mxu2 %v938_v25  ;;  %v1239_v63 = vld [vmem:[%s1808_s1 + $0x1d4] sm:$0xf0]  ;;  %v1007_v1 = vld [vmem:[%s1808_s1 + $0xb8] sm:$0xf0]  ;;  %v1233_v2 = vld [vmem:[%s1808_s1 + $0x1ac] sm:$0xf]  ;;  %v1022_v4 = vor.u32 %v1207_v60, %v1021_v59 }
  0x3a   : > { %665 = vmatpush.bf16.msra.mxu3 %v1066_v28  ;;  %v1135_v3 = vld [vmem:[%s1808_s1 + $0x1b8] sm:$0xf0]  ;;  %v1150_v5 = vor.u32 %v1239_v63, %v1149_v61  ;;  %v1010_v6 = vor.u32 %v1201_v0, %v1007_v1  ;;  %v1005_v7 = vld [vmem:[%s1808_s1 + $0xa8] sm:$0xf]  ;;  %v1203_v8 = vld [vmem:[%s1808_s1 + $0xb4] sm:$0xf0] }
  0x3b   : > { %v1133_v9 = vld [vmem:[%s1808_s1 + $0x1a8] sm:$0xf]  ;;  %v1138_v10 = vor.u32 %v1233_v2, %v1135_v3  ;;  %v1235_v11 = vld [vmem:[%s1808_s1 + $0x1b4] sm:$0xf0]  ;;  %v1197_v12 = vld [vmem:[%s1808_s1 + $0x8c] sm:$0xf]  ;;  %v1006_v16 = vor.u32 %v1203_v8, %v1005_v7 }
  0x3c   : > { %609 = vmatpush.bf16.msra.mxu0 %v918_v35  ;;  %v991_v13 = vld [vmem:[%s1808_s1 + $0x98] sm:$0xf0]  ;;  %v1229_v14 = vld [vmem:[%s1808_s1 + $0x18c] sm:$0xf]  ;;  %v989_v17 = vld [vmem:[%s1808_s1 + $0x88] sm:$0xf]  ;;  %v1134_v18 = vor.u32 %v1235_v11, %v1133_v9 }
  0x3d   : > { %628 = vmatpush.bf16.msra.mxu1 %v1046_v39  ;;  %647 = vmatpush.bf16.msra.mxu2 %v922_v40  ;;  %v1119_v15 = vld [vmem:[%s1808_s1 + $0x198] sm:$0xf0]  ;;  %v994_v19 = vor.u32 %v1197_v12, %v991_v13  ;;  %v1199_v20 = vld [vmem:[%s1808_s1 + $0x94] sm:$0xf0]  ;;  %v1117_v21 = vld [vmem:[%s1808_s1 + $0x188] sm:$0xf] }
  0x3e   : > { %666 = vmatpush.bf16.msra.mxu3 %v1050_v43  ;;  %v1231_v22 = vld [vmem:[%s1808_s1 + $0x194] sm:$0xf0]  ;;  %v1122_v23 = vor.u32 %v1229_v14, %v1119_v15  ;;  %v909_v24 = vld [vmem:[%s1561_s28 + $0x10] sm:$0xf]  ;;  %v1193_v25 = vld [vmem:[%s1808_s1 + $0x6c] sm:$0xf]  ;;  %v990_v30 = vor.u32 %v1199_v20, %v989_v17 }
  0x3f   : > { %610 = vmatmul.bf16.vlgmr.msra.gmra.mxu0 %v1579_v48  ;;  %v975_v26 = vld [vmem:[%s1808_s1 + $0x78] sm:$0xf0]  ;;  %v1179_v27 = vld [vmem:[%s1561_s28 + $0x14] sm:$0xf0]  ;;  %v1225_v28 = vld [vmem:[%s1808_s1 + $0x16c] sm:$0xf]  ;;  %v1118_v33 = vor.u32 %v1231_v22, %v1117_v21 }
  0x40   : > { %629 = vmatmul.bf16.vlgmr.msra.gmra.mxu1 %v1590_v53  ;;  %648 = vmatmul.bf16.vlgmr.msra.gmra.mxu2 %v1579_v48  ;;  %v1103_v29 = vld [vmem:[%s1808_s1 + $0x178] sm:$0xf0]  ;;  %v1178_v31 = vld [vmem:[%s1561_s28 + $0x14] sm:$0xf]  ;;  %v978_v34 = vor.u32 %v1193_v25, %v975_v26  ;;  %v973_v35 = vld [vmem:[%s1808_s1 + $0x68] sm:$0xf]  ;;  %v1687_v38 = vor.u32 %v1179_v27, %v909_v24 }
  0x41   : > { %716 = vmatpush.bf16.msrb.mxu2 %v1042_v44  ;;  %667 = vmatmul.bf16.vlgmr.msra.gmra.mxu3 %v1590_v53  ;;  %v911_v32 = vld [vmem:[%s1561_s28 + $0x18] sm:$0xf0]  ;;  %v1195_v36 = vld [vmem:[%s1808_s1 + $0x74] sm:$0xf0]  ;;  %v1101_v37 = vld [vmem:[%s1808_s1 + $0x168] sm:$0xf]  ;;  %v1106_v39 = vor.u32 %v1225_v28, %v1103_v29 }
  0x42   : > { %735 = vmatpush.bf16.msrb.mxu3 %v1170_v49  ;;  %678 = vmatpush.bf16.msrb.mxu0 %v1038_v56  ;;  %v1227_v40 = vld [vmem:[%s1808_s1 + $0x174] sm:$0xf0]  ;;  %v1189_v41 = vld [vmem:[%s1808_s1 + $0x4c] sm:$0xf]  ;;  %v959_v42 = vld [vmem:[%s1808_s1 + $0x58] sm:$0xf0]  ;;  %v1698_v43 = vor.u32 %v1178_v31, %v911_v32  ;;  %v974_v46 = vor.u32 %v1195_v36, %v973_v35 }
  0x43   : > { %697 = vmatpush.bf16.msrb.mxu1 %v1166_v57  ;;  %v1221_v44 = vld [vmem:[%s1808_s1 + $0x14c] sm:$0xf]  ;;  %v1087_v45 = vld [vmem:[%s1808_s1 + $0x158] sm:$0xf0]  ;;  %v1102_v47 = vor.u32 %v1227_v40, %v1101_v37  ;;  %v962_v49 = vor.u32 %v1189_v41, %v959_v42  ;;  %v957_v50 = vld [vmem:[%s1808_s1 + $0x48] sm:$0xf] }
  0x44   : > { %v1191_v51 = vld [vmem:[%s1808_s1 + $0x54] sm:$0xf0]  ;;  %v1085_v52 = vld [vmem:[%s1808_s1 + $0x148] sm:$0xf]  ;;  %v1090_v54 = vor.u32 %v1221_v44, %v1087_v45  ;;  %v1185_v56 = vld [vmem:[%s1808_s1 + $0x2c] sm:$0xf] }
  0x45   : > { %717 = vmatpush.bf16.msrb.mxu2 %v1026_v58  ;;  %v1223_v55 = vld [vmem:[%s1808_s1 + $0x154] sm:$0xf0]  ;;  %v943_v57 = vld [vmem:[%s1808_s1 + $0x38] sm:$0xf0]  ;;  %v1217_v58 = vld [vmem:[%s1808_s1 + $0x12c] sm:$0xf]  ;;  %v958_v60 = vor.u32 %v1191_v51, %v957_v50 }
  0x46   : > { %736 = vmatpush.bf16.msrb.mxu3 %v1154_v62  ;;  %679 = vmatpush.bf16.msrb.mxu0 %v1022_v4  ;;  %v1071_v59 = vld [vmem:[%s1808_s1 + $0x138] sm:$0xf0]  ;;  %v1086_v61 = vor.u32 %v1223_v55, %v1085_v52  ;;  %v946_v62 = vor.u32 %v1185_v56, %v943_v57  ;;  %v941_v63 = vld [vmem:[%s1808_s1 + $0x28] sm:$0xf]  ;;  %v1187_v0 = vld [vmem:[%s1808_s1 + $0x34] sm:$0xf0] }
  0x47   : > { %698 = vmatpush.bf16.msrb.mxu1 %v1150_v5  ;;  %v1069_v1 = vld [vmem:[%s1808_s1 + $0x128] sm:$0xf]  ;;  %v1074_v2 = vor.u32 %v1217_v58, %v1071_v59  ;;  %v1219_v3 = vld [vmem:[%s1808_s1 + $0x134] sm:$0xf0]  ;;  %v1181_v4 = vld [vmem:[%s1808_s1 + $0xc] sm:$0xf]  ;;  %v942_v8 = vor.u32 %v1187_v0, %v941_v63 }
  0x48   : > { %v927_v5 = vld [vmem:[%s1808_s1 + $0x18] sm:$0xf0]  ;;  %v1070_v9 = vor.u32 %v1219_v3, %v1069_v1  ;;  %v925_v11 = vld [vmem:[%s1808_s1 + $0x8] sm:$0xf]  ;;  %v1183_v12 = vld [vmem:[%s1808_s1 + $0x14] sm:$0xf0] }
  0x49   : > { %718 = vmatpush.bf16.msrb.mxu2 %v1010_v6  ;;  %v1213_v6 = vld [vmem:[%s1808_s1 + $0x10c] sm:$0xf]  ;;  %v1055_v7 = vld [vmem:[%s1808_s1 + $0x118] sm:$0xf0]  ;;  %v1053_v14 = vld [vmem:[%s1808_s1 + $0x108] sm:$0xf] }
  0x4a   : > { %737 = vmatpush.bf16.msrb.mxu3 %v1138_v10  ;;  %680 = vmatpush.bf16.msrb.mxu0 %v1006_v16  ;;  %v930_v10 = vor.u32 %v1181_v4, %v927_v5  ;;  %v1058_v13 = vor.u32 %v1213_v6, %v1055_v7  ;;  %v1215_v15 = vld [vmem:[%s1808_s1 + $0x114] sm:$0xf0]  ;;  %v926_v16 = vor.u32 %v1183_v12, %v925_v11  ;;  %s1815_s12 = smov (!%p1780_p8, %s887_s12), 1 }
  0x4b   : > { %699 = vmatpush.bf16.msrb.mxu1 %v1134_v18  ;;  %v1054_v17 = vor.u32 %v1215_v15, %v1053_v14  ;;  %s1175_s14 = sshll.u32 %s1815_s12, 5 }
  0x4c   : > { %s1791_s17 = scalar_lea.vmem %s1809_s2, %s1175_s14 }
  0x4d   : > { %719 = vmatpush.bf16.msrb.mxu2 %v994_v19 }
  0x4e   : > { %738 = vmatpush.bf16.msrb.mxu3 %v1122_v23  ;;  %681 = vmatpush.bf16.msrb.mxu0 %v990_v30 }
  0x4f   : > { %700 = vmatpush.bf16.msrb.mxu1 %v1118_v33  ;;  %615 = vmatmul.bf16.gmra.mxu0 %v1687_v38 }
  0x50   : > { %634 = vmatmul.bf16.gmra.mxu1 %v1698_v43  ;;  %653 = vmatmul.bf16.gmra.mxu2 %v1687_v38 }
  0x51   : > { %720 = vmatpush.bf16.msrb.mxu2 %v978_v34  ;;  %672 = vmatmul.bf16.gmra.mxu3 %v1698_v43 }
  0x52   : > { %739 = vmatpush.bf16.msrb.mxu3 %v1106_v39  ;;  %682 = vmatpush.bf16.msrb.mxu0 %v974_v46 }
  0x53   : > { %701 = vmatpush.bf16.msrb.mxu1 %v1102_v47 }
  0x55   : > { %721 = vmatpush.bf16.msrb.mxu2 %v962_v49 }
  0x56   : > { %740 = vmatpush.bf16.msrb.mxu3 %v1090_v54  ;;  %683 = vmatpush.bf16.msrb.mxu0 %v958_v60 }
  0x57   : > { %702 = vmatpush.bf16.msrb.mxu1 %v1086_v61 }
  0x59   : > { %722 = vmatpush.bf16.msrb.mxu2 %v946_v62 }
  0x5a   : > { %741 = vmatpush.bf16.msrb.mxu3 %v1074_v2  ;;  %684 = vmatpush.bf16.msrb.mxu0 %v942_v8 }
  0x5b   : > { %703 = vmatpush.bf16.msrb.mxu1 %v1070_v9 }
  0x5d   : > { %723 = vmatpush.bf16.msrb.mxu2 %v930_v10 }
  0x5e   : > { %742 = vmatpush.bf16.msrb.mxu3 %v1058_v13  ;;  %685 = vmatpush.bf16.msrb.mxu0 %v926_v16 }
  0x5f   : > { %704 = vmatpush.bf16.msrb.mxu1 %v1054_v17 }
  0x60   : > { %724 = vmatmul.bf16.vlgmr.msrb.gmra.mxu2 %v1579_v48 }
  0x61   : > { %686 = vmatmul.bf16.vlgmr.msrb.gmra.mxu0 %v1579_v48  ;;  %743 = vmatmul.bf16.vlgmr.msrb.gmra.mxu3 %v1590_v53 }
  0x62   : > { %705 = vmatmul.bf16.vlgmr.msrb.gmra.mxu1 %v1590_v53 }
  0x70   : > { %729 = vmatmul.bf16.gmra.mxu2 %v1687_v38 }
  0x71   : > { %691 = vmatmul.bf16.gmra.mxu0 %v1687_v38  ;;  %748 = vmatmul.bf16.gmra.mxu3 %v1698_v43 }
  0x72   : > { %710 = vmatmul.bf16.gmra.mxu1 %v1698_v43 }
  0xbc   : > { %v611_v18 = vpop.f32.mrf.mxu0 }
  0xbd   : > { %v630_v19 = vpop.f32.mrf.mxu1 }
  0xbe   : > { %v631_v42 = vadd.f32 %v630_v19, %v611_v18 }
  0xc0   : > { %v754_v51 = vmul.f32 %v631_v42, %v631_v42 }
  0xc3   : > { %v649_v20 = vpop.f32.mrf.mxu2 }
  0xc4   : > { %v668_v21 = vpop.f32.mrf.mxu3  ;;  %v613_v22 = vpop.f32.mrf.mxu0 }
  0xc5   : > { %v632_v23 = vpop.f32.mrf.mxu1  ;;  %v669_v61 = vadd.f32 %v668_v21, %v649_v20 }
  0xc6   : > { %v633_v45 = vadd.f32 %v632_v23, %v613_v22 }
  0xc7   : > { %v755_v12 = vmul.f32 %v669_v61, %v669_v61 }
  0xc8   : > { %v756_v55 = vmul.f32 %v633_v45, %v633_v45 }
  0xcb   : > { %v651_v24 = vpop.f32.mrf.mxu2 }
  0xcc   : > { %v670_v48 = vpop.f32.mrf.mxu3  ;;  %v616_v25 = vpop.f32.mrf.mxu0 }
  0xcd   : > { %v635_v26 = vpop.f32.mrf.mxu1  ;;  %v671_v5 = vadd.f32 %v670_v48, %v651_v24 }
  0xce   : > { %v636_v43 = vadd.f32 %v635_v26, %v616_v25 }
  0xcf   : > { %v757_v18 = vmul.f32 %v671_v5, %v671_v5 }
  0xd0   : > { %v758_v52 = vmul.f32 %v636_v43, %v636_v43 }
  0xd3   : > { %v654_v27 = vpop.f32.mrf.mxu2 }
  0xd4   : > { %v673_v53 = vpop.f32.mrf.mxu3  ;;  %v618_v28 = vpop.f32.mrf.mxu0 }
  0xd5   : > { %v637_v29 = vpop.f32.mrf.mxu1  ;;  %v674_v57 = vadd.f32 %v673_v53, %v654_v27 }
  0xd6   : > { %v638_v1 = vadd.f32 %v637_v29, %v618_v28 }
  0xd7   : > { %v759_v8 = vmul.f32 %v674_v57, %v674_v57 }
  0xd8   : > { %v760_v15 = vmul.f32 %v638_v1, %v638_v1 }
  0xdb   : > { %v656_v30 = vpop.f32.mrf.mxu2 }
  0xdc   : > { %v675_v31 = vpop.f32.mrf.mxu3 }
  0xdd   : > { %v676_v23 = vadd.f32 %v675_v31, %v656_v30 }
  0xde   : > { %v687_v32 = vpop.f32.mrf.mxu0 }
  0xdf   : > { %v706_v33 = vpop.f32.mrf.mxu1 }
  0xe0   : > { %v707_v38 = vadd.f32 %v706_v33, %v687_v32 }
  0xe2   : > { %v762_v47 = vmul.f32 %v707_v38, %v707_v38 }
  0xe3   : > { %v725_v34 = vpop.f32.mrf.mxu2 }
  0xe4   : > { %v744_v35 = vpop.f32.mrf.mxu3  ;;  %v770_v58 = vadd.f32 %v762_v47, %v754_v51 }
  0xe5   : > { %v745_v56 = vadd.f32 %v744_v35, %v725_v34  ;;  %v761_v34 = vmul.f32 %v676_v23, %v676_v23 }
  0xe6   : > { %v689_v36 = vpop.f32.mrf.mxu0  ;;  %v786_v9 = vadd.f32 1e-07, %v770_v58 }
  0xe7   : > { %v708_v37 = vpop.f32.mrf.mxu1  ;;  %v763_v6 = vmul.f32 %v745_v56, %v745_v56 }
  0xe8   : > { %v709_v40 = vadd.f32 %v708_v37, %v689_v36 }
  0xe9   : > { %v771_v19 = vadd.f32 %v763_v6, %v755_v12 }
  0xea   : > { %v764_v50 = vmul.f32 %v709_v40, %v709_v40 }
  0xeb   : > { %v727_v39 = vpop.f32.mrf.mxu2  ;;  %v787_v53 = vadd.f32 1e-07, %v771_v19 }
  0xec   : > { %v746_v41 = vpop.f32.mrf.mxu3  ;;  %v772_v62 = vadd.f32 %v764_v50, %v756_v55 }
  0xed   : > { %v747_v63 = vadd.f32 %v746_v41, %v727_v39 }
  0xee   : > { %v692_v44 = vpop.f32.mrf.mxu0  ;;  %v788_v13 = vadd.f32 1e-07, %v772_v62 }
  0xef   : > { %v711_v46 = vpop.f32.mrf.mxu1  ;;  %v765_v14 = vmul.f32 %v747_v63, %v747_v63 }
  0xf0   : > { %v712_v49 = vadd.f32 %v711_v46, %v692_v44 }
  0xf1   : > { %v773_v24 = vadd.f32 %v765_v14, %v757_v18 }
  0xf2   : > { %v766_v54 = vmul.f32 %v712_v49, %v712_v49 }
  0xf3   : > { %v730_v60 = vpop.f32.mrf.mxu2  ;;  %v789_v35 = vadd.f32 1e-07, %v773_v24 }
  0xf4   : > { %v774_v59 = vadd.f32 %v766_v54, %v758_v52  ;;  %v749_v0 = vpop.f32.mrf.mxu3 }
  0xf5   : > { %v750_v3 = vadd.f32 %v749_v0, %v730_v60 }
  0xf6   : > { %v798_v2 = vadd.f32 1e-07, %v774_v59  ;;  %v694_v4 = vpop.f32.mrf.mxu0  ;;  %v778_v20 = vsub.f32 %v774_v59, %v770_v58 }
  0xf7   : > { %v713_v7 = vpop.f32.mrf.mxu1  ;;  %v767_v10 = vmul.f32 %v750_v3, %v750_v3 }
  0xf8   : > { %v714_v11 = vadd.f32 %v713_v7, %v694_v4  ;;  %1268 = vlog2.f32 %v798_v2  ;;  %v782_v32 = vand.u32 2147483647, %v778_v20 }
  0xf9   : > { %v775_v16 = vadd.f32 %v767_v10, %v759_v8  ;;  %1270 = vlog2.f32 %v786_v9 }
  0xfa   : > { %v768_v17 = vmul.f32 %v714_v11, %v714_v11  ;;  %1272 = vlog2.f32 %v788_v13 }
  0xfb   : > { %v732_v22 = vpop.f32.mrf.mxu2  ;;  %v799_v48 = vadd.f32 1e-07, %v775_v16  ;;  %v779_v36 = vsub.f32 %v775_v16, %v771_v19 }
  0xfc   : > { %v776_v21 = vadd.f32 %v768_v17, %v760_v15  ;;  %v751_v25 = vpop.f32.mrf.mxu3 }
  0xfd   : > { %v752_v28 = vadd.f32 %v751_v25, %v732_v22  ;;  %v783_v46 = vand.u32 2147483647, %v779_v36 }
  0xfe   : > { %v780_v26 = vsub.f32 %v776_v21, %v772_v62  ;;  %v800_v27 = vadd.f32 1e-07, %v776_v21  ;;  %v1269_v29 = vpop.eup %1268 }
  0xff   : > { %v769_v30 = vmul.f32 %v752_v28, %v752_v28  ;;  %v1271_v31 = vpop.eup %1270  ;;  %v803_v39 = vmul.f32 0.6931472, %v1269_v29 }
 0x100   : > { %v784_v33 = vand.u32 2147483647, %v780_v26  ;;  %1274 = vlog2.f32 %v800_v27  ;;  %v1273_v38 = vpop.eup %1272  ;;  %v791_v41 = vmul.f32 0.6931472, %v1271_v31 }
 0x101   : > { %1276 = vlog2.f32 %v799_v48  ;;  %v777_v40 = vadd.f32 %v769_v30, %v761_v34  ;;  %v795_v45 = vmul.f32 0.6931472, %v1273_v38 }
 0x102   : > { %v818_v37 = vadd.f32 %v784_v33, %v782_v32  ;;  %1278 = vlog2.f32 %v787_v53  ;;  %v810_v49 = vsub.f32 %v791_v41, %v803_v39 }
 0x103   : > { %1280 = vlog2.f32 %v789_v35  ;;  %v781_v42 = vsub.f32 %v777_v40, %v773_v24  ;;  %v801_v43 = vadd.f32 1e-07, %v777_v40 }
 0x104   : > { %820 = vst [vmem:[%s1791_s17] sm:$0xff] %v818_v37  ;;  %v814_v58 = vand.u32 2147483647, %v810_v49 }
 0x105   : > { %v785_v51 = vand.u32 2147483647, %v781_v42  ;;  %1282 = vlog2.f32 %v801_v43 }
 0x106   : > { %v1275_v44 = vpop.eup %1274 }
 0x107   : > { %v1277_v47 = vpop.eup %1276  ;;  %v807_v50 = vmul.f32 0.6931472, %v1275_v44  ;;  %v819_v55 = vadd.f32 %v785_v51, %v783_v46 }
 0x108   : > { %v1279_v52 = vpop.eup %1278  ;;  %v805_v56 = vmul.f32 0.6931472, %v1277_v47 }
 0x109   : > { %v812_v54 = vsub.f32 %v795_v45, %v807_v50  ;;  %v1281_v57 = vpop.eup %1280  ;;  %821 = vst [vmem:[%s1791_s17 + $0x8] sm:$0xff] %v819_v55  ;;  %v793_v60 = vmul.f32 0.6931472, %v1279_v52 }
 0x10a   : > { %v797_v63 = vmul.f32 0.6931472, %v1281_v57 }
 0x10b   : > { %v816_v59 = vand.u32 2147483647, %v812_v54  ;;  %v1283_v61 = vpop.eup %1282  ;;  %v811_v0 = vsub.f32 %v793_v60, %v805_v56 }
 0x10c   : > { %v809_v1 = vmul.f32 0.6931472, %v1283_v61 }
 0x10d   : > { %v822_v62 = vadd.f32 %v816_v59, %v814_v58  ;;  %v815_v3 = vand.u32 2147483647, %v811_v0 }
 0x10e   : > { %v813_v2 = vsub.f32 %v797_v63, %v809_v1 }
 0x10f   : > { %824 = vst [vmem:[%s1791_s17 + $0x10] sm:$0xff] %v822_v62 }
 0x110   : > { %v817_v4 = vand.u32 2147483647, %v813_v2 }
 0x112   : > { %v823_v5 = vadd.f32 %v817_v4, %v815_v3 }
 0x114   : > { %825 = vst [vmem:[%s1791_s17 + $0x18] sm:$0xff] %v823_v5 }
 0x115 PF: > { %p9_p9 = scmp.ge.s32.totalorder %s1340_s13, 4   ;;  %s1811_s9 = smov %s1302_s10 }
 0x116   : > { %s1812_s10 = smov %s1349_s16  ;;  %s1813_s11 = smov %s1340_s13 }
 0x117   :  { %11 = sbr.rel (!%p9_p9) target bundleno = 2 (0x2), region = 101 }

// kernel: hybrid_loss.4
= control target key start
LH: loop header
LB: loop body
LE: loop exit
PB: predicated region body
PF: predicated region fallthrough
CT: control target
= control target key end

     0   :  { %s746_s9 = smov 0   ;;  %s748_s10 = smov 0   ;;  %s896_s0 = inlined_call_operand.vmem [shape: bf16[2,64,128], index: 0, kind: input, shape index: {}]   ;;  %s897_s1 = inlined_call_operand.vmem [shape: bf16[128,256], index: 1, kind: input, shape index: {}]   ;;  %s898_s2 = inlined_call_operand.vmem [shape: f32[16,256], index: 2, kind: output, shape index: {}]  }
   0x1   :  { %s750_s11 = smov 0  }
   0x2 LB: > { %s536_s12 = sadd.s32 4294967295, %s729_s11   ;;  %s763_s13 = sadd.s32 1, %s729_s11   ;;  %s729_s11 = sphi %s750_s11, %s901_s11   ;;  %s725_s10 = sphi %s748_s10, %s900_s10   ;;  %s721_s9 = sphi %s746_s9, %s899_s9  }
   0x3   : > { %s16_s14 = ssub.s32 %s729_s11, %s763_s13  ;;  %s19_s15 = sadd.s32 1, %s725_s10 }
   0x4   : > { %p17_p0 = scmp.eq.s32.totalorder %s16_s14, 0  ;;  %p26_p1 = scmp.ne.s32.totalorder %s725_s10, %s721_s9 }
   0x5   : > { %p27_p2 = scmp.eq.s32.totalorder %s729_s11, 0  ;;  %p539_p4 = scmp.ge.s32.totalorder %s729_s11, 2 }
   0x6   : > { %s772_s16 = scalar_select %p17_p0, %s725_s10, %s19_s15  }
   0x7   : > { %p28_p3 = por %p27_p2, %p26_p1  ;;  %102 = sbr.rel (%p539_p4) target bundleno = 20 (0x14), region = 20 }
   0xc   : > { %105 = sbr.rel (!%p28_p3) target bundleno = 20 (0x14), region = 24  ;;  %s107_s17 = sand.u32 (%p28_p3), 1, %s725_s10  }
   0xd   : > { %s629_s18 = sshll.u32 (%p28_p3), %s729_s11, 4  ;;  %s540_s19 = sshll.u32 (%p28_p3), %s107_s17, 5 }
   0xe   : > { %s112_s22 = scalar_lea.vmem (%p28_p3), %s896_s0, %s629_s18  ;;  %s109_s23 = scalar_lea.vmem (%p28_p3), [#allocation2], %s540_s19 }
   0xf   : > { %v129_v0 = vld [vmem:[%s112_s22] sm:$0xff] (%p28_p3)   ;;  %v133_v1 = vld [vmem:[%s112_s22 + $0x8] sm:$0xff] (%p28_p3)  }
  0x10   : > { %v137_v2 = vld [vmem:[%s112_s22 + $0x20] sm:$0xff] (%p28_p3)   ;;  %130 = vst [vmem:[%s109_s23] sm:$0xff] (%p28_p3), %v129_v0   ;;  %v141_v3 = vld [vmem:[%s112_s22 + $0x28] sm:$0xff] (%p28_p3)  }
  0x11   : > { %134 = vst [vmem:[%s109_s23 + $0x8] sm:$0xff] %v133_v1  }
  0x12   : > { %138 = vst [vmem:[%s109_s23 + $0x10] sm:$0xff] %v137_v2  }
  0x13   : > { %142 = vst [vmem:[%s109_s23 + $0x18] sm:$0xff] %v141_v3  }
  0x14 PF: > { %p543_p5 = scmp.ge.s32.totalorder %s729_s11, 1  ;;  %p183_p6 = scmp.lt.s32.totalorder %s729_s11, 3 }
  0x16   : > { %p184_p7 = pnand %p543_p5, %p183_p6 }
  0x17   : > { %s190_s8 = sand.u32 (!%p184_p7), 1, %s721_s9   ;;  %p212_p8 = scmp.lt.s32.totalorder (!%p184_p7), %s536_s12, 1 }
  0x18   : > { %187 = sbr.rel (%p184_p7) target bundleno = 242 (0xf2), region = 65  ;;  %s544_s19 = sshll.u32 (!%p184_p7), %s190_s8, 5 }
  0x19   : > { %s192_s23 = scalar_lea.vmem (!%p184_p7), [#allocation2], %s544_s19 }
  0x1d   : > { %v621_v4 = vld [vmem:[%s897_s1 + $0x70] sm:$0xf]  ;;  %v650_v5 = vld [vmem:[%s897_s1 + $0x74] sm:$0xf0]  ;;  %v649_v6 = vld [vmem:[%s897_s1 + $0x74] sm:$0xf] }
  0x1e   : > { %v622_v7 = vor.u32 %v650_v5, %v621_v4  ;;  %v623_v8 = vld [vmem:[%s897_s1 + $0x78] sm:$0xf0]  ;;  %v613_v9 = vld [vmem:[%s897_s1 + $0x60] sm:$0xf]  ;;  %v648_v10 = vld [vmem:[%s897_s1 + $0x64] sm:$0xf0] }
  0x1f   : > { %v626_v11 = vor.u32 %v649_v6, %v623_v8  ;;  %v647_v12 = vld [vmem:[%s897_s1 + $0x64] sm:$0xf]  ;;  %v615_v13 = vld [vmem:[%s897_s1 + $0x68] sm:$0xf0]  ;;  %v614_v14 = vor.u32 %v648_v10, %v613_v9  ;;  %v605_v16 = vld [vmem:[%s897_s1 + $0x50] sm:$0xf] }
  0x20   : > { %345 = vmatpush.bf16.msra.mxu0 %v622_v7  ;;  %651 = vmatpush.bf16.msra.mxu2 %v622_v7  ;;  %v618_v15 = vor.u32 %v647_v12, %v615_v13  ;;  %v646_v17 = vld [vmem:[%s897_s1 + $0x54] sm:$0xf0]  ;;  %v645_v18 = vld [vmem:[%s897_s1 + $0x54] sm:$0xf]  ;;  %v607_v19 = vld [vmem:[%s897_s1 + $0x58] sm:$0xf0] }
  0x21   : > { %374 = vmatpush.bf16.msra.mxu1 %v626_v11  ;;  %659 = vmatpush.bf16.msra.mxu3 %v626_v11  ;;  %v606_v20 = vor.u32 %v646_v17, %v605_v16  ;;  %v610_v21 = vor.u32 %v645_v18, %v607_v19  ;;  %v597_v22 = vld [vmem:[%s897_s1 + $0x40] sm:$0xf]  ;;  %v644_v23 = vld [vmem:[%s897_s1 + $0x44] sm:$0xf0]  ;;  %v643_v24 = vld [vmem:[%s897_s1 + $0x44] sm:$0xf] }
  0x22   : > { %v599_v25 = vld [vmem:[%s897_s1 + $0x48] sm:$0xf0]  ;;  %v598_v26 = vor.u32 %v644_v23, %v597_v22  ;;  %v589_v28 = vld [vmem:[%s897_s1 + $0x30] sm:$0xf]  ;;  %v642_v29 = vld [vmem:[%s897_s1 + $0x34] sm:$0xf0] }
  0x23   : > { %v602_v27 = vor.u32 %v643_v24, %v599_v25  ;;  %v641_v30 = vld [vmem:[%s897_s1 + $0x34] sm:$0xf]  ;;  %v591_v31 = vld [vmem:[%s897_s1 + $0x38] sm:$0xf0]  ;;  %v590_v32 = vor.u32 %v642_v29, %v589_v28  ;;  %v581_v34 = vld [vmem:[%s897_s1 + $0x20] sm:$0xf] }
  0x24   : > { %346 = vmatpush.bf16.msra.mxu0 %v614_v14  ;;  %652 = vmatpush.bf16.msra.mxu2 %v614_v14  ;;  %v594_v33 = vor.u32 %v641_v30, %v591_v31  ;;  %v640_v35 = vld [vmem:[%s897_s1 + $0x24] sm:$0xf0]  ;;  %v639_v36 = vld [vmem:[%s897_s1 + $0x24] sm:$0xf]  ;;  %v583_v37 = vld [vmem:[%s897_s1 + $0x28] sm:$0xf0] }
  0x25   : > { %375 = vmatpush.bf16.msra.mxu1 %v618_v15  ;;  %660 = vmatpush.bf16.msra.mxu3 %v618_v15  ;;  %v582_v38 = vor.u32 %v640_v35, %v581_v34  ;;  %v586_v39 = vor.u32 %v639_v36, %v583_v37  ;;  %v573_v40 = vld [vmem:[%s897_s1 + $0x10] sm:$0xf]  ;;  %v638_v41 = vld [vmem:[%s897_s1 + $0x14] sm:$0xf0]  ;;  %v637_v42 = vld [vmem:[%s897_s1 + $0x14] sm:$0xf] }
  0x26   : > { %v575_v43 = vld [vmem:[%s897_s1 + $0x18] sm:$0xf0]  ;;  %v574_v44 = vor.u32 %v638_v41, %v573_v40  ;;  %v565_v46 = vld [vmem:[%s897_s1] sm:$0xf]  ;;  %v636_v47 = vld [vmem:[%s897_s1 + $0x4] sm:$0xf0] }
  0x27   : > { %v578_v45 = vor.u32 %v637_v42, %v575_v43  ;;  %v635_v48 = vld [vmem:[%s897_s1 + $0x4] sm:$0xf]  ;;  %v567_v49 = vld [vmem:[%s897_s1 + $0x8] sm:$0xf0]  ;;  %v566_v50 = vor.u32 %v636_v47, %v565_v46  ;;  %v633_v53 = vld [vmem:[%s192_s23 + $0x10] sm:$0xff]  ;;  %s903_s12 = smov (!%p212_p8, %s536_s12), 1 }
  0x28   : > { %347 = vmatpush.bf16.msra.mxu0 %v606_v20  ;;  %653 = vmatpush.bf16.msra.mxu2 %v606_v20  ;;  %v570_v51 = vor.u32 %v635_v48, %v567_v49  ;;  %v631_v52 = vld [vmem:[%s192_s23] sm:$0xff]  ;;  %v632_v54 = vld [vmem:[%s192_s23 + $0x8] sm:$0xff]  ;;  %v634_v55 = vld [vmem:[%s192_s23 + $0x18] sm:$0xff]  ;;  %s630_s24 = sshll.u32 %s903_s12, 4 }
  0x29   : > { %376 = vmatpush.bf16.msra.mxu1 %v610_v21  ;;  %661 = vmatpush.bf16.msra.mxu3 %v610_v21  ;;  %s216_s26 = scalar_lea.vmem %s898_s2, %s630_s24 }
  0x2c   : > { %348 = vmatpush.bf16.msra.mxu0 %v598_v26  ;;  %654 = vmatpush.bf16.msra.mxu2 %v598_v26 }
  0x2d   : > { %377 = vmatpush.bf16.msra.mxu1 %v602_v27  ;;  %662 = vmatpush.bf16.msra.mxu3 %v602_v27 }
  0x30   : > { %349 = vmatpush.bf16.msra.mxu0 %v590_v32  ;;  %655 = vmatpush.bf16.msra.mxu2 %v590_v32 }
  0x31   : > { %378 = vmatpush.bf16.msra.mxu1 %v594_v33  ;;  %663 = vmatpush.bf16.msra.mxu3 %v594_v33 }
  0x34   : > { %350 = vmatpush.bf16.msra.mxu0 %v582_v38  ;;  %656 = vmatpush.bf16.msra.mxu2 %v582_v38 }
  0x35   : > { %379 = vmatpush.bf16.msra.mxu1 %v586_v39  ;;  %664 = vmatpush.bf16.msra.mxu3 %v586_v39 }
  0x38   : > { %351 = vmatpush.bf16.msra.mxu0 %v574_v44  ;;  %657 = vmatpush.bf16.msra.mxu2 %v574_v44 }
  0x39   : > { %380 = vmatpush.bf16.msra.mxu1 %v578_v45  ;;  %665 = vmatpush.bf16.msra.mxu3 %v578_v45 }
  0x3c   : > { %352 = vmatpush.bf16.msra.mxu0 %v566_v50  ;;  %658 = vmatpush.bf16.msra.mxu2 %v566_v50 }
  0x3d   : > { %381 = vmatpush.bf16.msra.mxu1 %v570_v51  ;;  %666 = vmatpush.bf16.msra.mxu3 %v570_v51 }
  0x3f   : > { %353 = vmatmul.bf16.vlgmr.msra.gmra.mxu0 %v631_v52  ;;  %363 = vmatmul.bf16.vlgmr.msra.gmra.mxu2 %v633_v53 }
  0x40   : > { %382 = vmatmul.bf16.vlgmr.msra.gmra.mxu1 %v631_v52  ;;  %392 = vmatmul.bf16.vlgmr.msra.gmra.mxu3 %v633_v53 }
  0x4f   : > { %358 = vmatmul.bf16.gmra.mxu0 %v632_v54  ;;  %368 = vmatmul.bf16.gmra.mxu2 %v634_v55 }
  0x50   : > { %387 = vmatmul.bf16.gmra.mxu1 %v632_v54  ;;  %397 = vmatmul.bf16.gmra.mxu3 %v634_v55 }
  0xbc   : > { %v354_v56 = vpop.f32.mrf.mxu0 }
  0xbd   : > { %v383_v57 = vpop.f32.mrf.mxu1  ;;  %v403_v62 = vmul.f32 %v354_v56, %v354_v56 }
  0xbe   : > { %v411_v63 = vmul.f32 %v383_v57, %v383_v57 }
  0xc0   : > { %v419_v7 = vadd.f32 %v411_v63, %v403_v62 }
  0xc2   : > { %v364_v58 = vpop.f32.mrf.mxu2  ;;  %v435_v16 = vadd.f32 1e-07, %v419_v7 }
  0xc3   : > { %v393_v59 = vpop.f32.mrf.mxu3  ;;  %v407_v0 = vmul.f32 %v364_v58, %v364_v58 }
  0xc4   : > { %v356_v60 = vpop.f32.mrf.mxu0  ;;  %v415_v1 = vmul.f32 %v393_v59, %v393_v59  ;;  %691 = vlog2.f32 %v435_v16 }
  0xc5   : > { %v385_v61 = vpop.f32.mrf.mxu1  ;;  %v404_v3 = vmul.f32 %v356_v60, %v356_v60 }
  0xc6   : > { %v412_v4 = vmul.f32 %v385_v61, %v385_v61  ;;  %v423_v10 = vadd.f32 %v415_v1, %v407_v0 }
  0xc8   : > { %v420_v15 = vadd.f32 %v412_v4, %v404_v3  ;;  %v447_v18 = vadd.f32 1e-07, %v423_v10  ;;  %v427_v35 = vsub.f32 %v423_v10, %v419_v7 }
  0xca   : > { %v366_v2 = vpop.f32.mrf.mxu2  ;;  %v436_v21 = vadd.f32 1e-07, %v420_v15  ;;  %693 = vlog2.f32 %v447_v18  ;;  %v692_v34 = vpop.eup %691  ;;  %v431_v47 = vand.u32 2147483647, %v427_v35 }
  0xcb   : > { %v408_v5 = vmul.f32 %v366_v2, %v366_v2  ;;  %v395_v6 = vpop.f32.mrf.mxu3  ;;  %v440_v50 = vmul.f32 0.6931472, %v692_v34 }
  0xcc   : > { %v416_v8 = vmul.f32 %v395_v6, %v395_v6  ;;  %v359_v9 = vpop.f32.mrf.mxu0 }
  0xcd   : > { %v405_v11 = vmul.f32 %v359_v9, %v359_v9  ;;  %v388_v12 = vpop.f32.mrf.mxu1 }
  0xce   : > { %v424_v13 = vadd.f32 %v416_v8, %v408_v5  ;;  %v413_v14 = vmul.f32 %v388_v12, %v388_v12 }
  0xd0   : > { %v421_v17 = vadd.f32 %v413_v14, %v405_v11  ;;  %v448_v19 = vadd.f32 1e-07, %v424_v13  ;;  %v428_v31 = vsub.f32 %v424_v13, %v420_v15  ;;  %v694_v38 = vpop.eup %693 }
  0xd1   : > { %v452_v51 = vmul.f32 0.6931472, %v694_v38 }
  0xd2   : > { %v369_v20 = vpop.f32.mrf.mxu2  ;;  %v437_v24 = vadd.f32 1e-07, %v421_v17  ;;  %695 = vlog2.f32 %v448_v19  ;;  %v432_v42 = vand.u32 2147483647, %v428_v31 }
  0xd3   : > { %v409_v22 = vmul.f32 %v369_v20, %v369_v20  ;;  %v398_v23 = vpop.f32.mrf.mxu3  ;;  %697 = vlog2.f32 %v436_v21  ;;  %v459_v63 = vsub.f32 %v440_v50, %v452_v51 }
  0xd4   : > { %v417_v25 = vmul.f32 %v398_v23, %v398_v23  ;;  %v361_v26 = vpop.f32.mrf.mxu0  ;;  %699 = vlog2.f32 %v437_v24  ;;  %v467_v54 = vadd.f32 %v432_v42, %v431_v47 }
  0xd5   : > { %v406_v27 = vmul.f32 %v361_v26, %v361_v26  ;;  %v390_v28 = vpop.f32.mrf.mxu1  ;;  %v463_v5 = vand.u32 2147483647, %v459_v63 }
  0xd6   : > { %v425_v29 = vadd.f32 %v417_v25, %v409_v22  ;;  %v414_v30 = vmul.f32 %v390_v28, %v390_v28 }
  0xd8   : > { %v449_v32 = vadd.f32 1e-07, %v425_v29  ;;  %v422_v33 = vadd.f32 %v414_v30, %v406_v27  ;;  %v429_v36 = vsub.f32 %v425_v29, %v421_v17  ;;  %v696_v41 = vpop.eup %695 }
  0xd9   : > { %v698_v45 = vpop.eup %697  ;;  %v454_v52 = vmul.f32 0.6931472, %v696_v41 }
  0xda   : > { %701 = vlog2.f32 %v449_v32  ;;  %v371_v37 = vpop.f32.mrf.mxu2  ;;  %v438_v43 = vadd.f32 1e-07, %v422_v33  ;;  %v700_v46 = vpop.eup %699  ;;  %v433_v48 = vand.u32 2147483647, %v429_v36  ;;  %v442_v57 = vmul.f32 0.6931472, %v698_v45 }
  0xdb   : > { %v410_v39 = vmul.f32 %v371_v37, %v371_v37  ;;  %v400_v40 = vpop.f32.mrf.mxu3  ;;  %v444_v58 = vmul.f32 0.6931472, %v700_v46 }
  0xdc   : > { %v418_v44 = vmul.f32 %v400_v40, %v400_v40  ;;  %703 = vlog2.f32 %v438_v43  ;;  %v468_v60 = vadd.f32 %v467_v54, %v433_v48  ;;  %v460_v62 = vsub.f32 %v442_v57, %v454_v52 }
  0xde   : > { %v426_v49 = vadd.f32 %v418_v44, %v410_v39  ;;  %v464_v3 = vand.u32 2147483647, %v460_v62 }
  0xe0   : > { %v702_v53 = vpop.eup %701  ;;  %v430_v55 = vsub.f32 %v426_v49, %v422_v33  ;;  %v450_v56 = vadd.f32 1e-07, %v426_v49  ;;  %v471_v9 = vadd.f32 %v464_v3, %v463_v5 }
  0xe1   : > { %v456_v59 = vmul.f32 0.6931472, %v702_v53 }
  0xe2   : > { %v434_v61 = vand.u32 2147483647, %v430_v55  ;;  %705 = vlog2.f32 %v450_v56  ;;  %v704_v2 = vpop.eup %703 }
  0xe3   : > { %v461_v1 = vsub.f32 %v444_v58, %v456_v59  ;;  %v446_v7 = vmul.f32 0.6931472, %v704_v2 }
  0xe4   : > { %v469_v0 = vadd.f32 %v468_v60, %v434_v61 }
  0xe5   : > { %v465_v6 = vand.u32 2147483647, %v461_v1 }
  0xe6   : > { %470 = vst [vmem:[%s216_s26] sm:$0xff] %v469_v0 }
  0xe7   : > { %v472_v11 = vadd.f32 %v471_v9, %v465_v6 }
  0xe8   : > { %v706_v4 = vpop.eup %705 }
  0xe9   : > { %v458_v8 = vmul.f32 0.6931472, %v706_v4 }
  0xeb   : > { %v462_v10 = vsub.f32 %v446_v7, %v458_v8 }
  0xed   : > { %v466_v12 = vand.u32 2147483647, %v462_v10 }
  0xef   : > { %v473_v13 = vadd.f32 %v472_v11, %v466_v12 }
  0xf1   : > { %474 = vst [vmem:[%s216_s26 + $0x8] sm:$0xff] %v473_v13 }
  0xf2 PF: > { %p9_p9 = scmp.ge.s32.totalorder %s763_s13, 4   ;;  %s899_s9 = smov %s725_s10 }
  0xf3   : > { %s900_s10 = smov %s772_s16  ;;  %s901_s11 = smov %s763_s13 }
  0xf4   :  { %11 = sbr.rel (!%p9_p9) target bundleno = 2 (0x2), region = 104 }

// kernel: hybrid_loss.5
= control target key start
LH: loop header
LB: loop body
LE: loop exit
PB: predicated region body
PF: predicated region fallthrough
CT: control target
= control target key end

     0   :  { %s851_s9 = smov 0   ;;  %s853_s10 = smov 0   ;;  %s1014_s0 = inlined_call_operand.vmem [shape: bf16[2,96,128], index: 0, kind: input, shape index: {}]   ;;  %s1015_s1 = inlined_call_operand.vmem [shape: bf16[128,256], index: 1, kind: input, shape index: {}]   ;;  %s1016_s2 = inlined_call_operand.vmem [shape: f32[16,256], index: 2, kind: output, shape index: {}]  }
   0x1   :  { %s855_s11 = smov 0  }
   0x2 LB: > { %s624_s12 = sadd.s32 4294967295, %s834_s11   ;;  %s868_s13 = sadd.s32 1, %s834_s11   ;;  %s834_s11 = sphi %s855_s11, %s1020_s11   ;;  %s830_s10 = sphi %s853_s10, %s1019_s10   ;;  %s826_s9 = sphi %s851_s9, %s1018_s9  }
   0x3   : > { %s16_s14 = ssub.s32 %s834_s11, %s868_s13  ;;  %s19_s15 = sadd.s32 1, %s830_s10 }
   0x4   : > { %p17_p0 = scmp.eq.s32.totalorder %s16_s14, 0  ;;  %p26_p1 = scmp.ne.s32.totalorder %s830_s10, %s826_s9 }
   0x5   : > { %p27_p2 = scmp.eq.s32.totalorder %s834_s11, 0  ;;  %p627_p4 = scmp.ge.s32.totalorder %s834_s11, 2 }
   0x6   : > { %s877_s16 = scalar_select %p17_p0, %s830_s10, %s19_s15  }
   0x7   : > { %p28_p3 = por %p27_p2, %p26_p1  ;;  %102 = sbr.rel (%p627_p4) target bundleno = 23 (0x17), region = 20 }
   0xc   : > { %105 = sbr.rel (!%p28_p3) target bundleno = 23 (0x17), region = 24  ;;  %s107_s17 = sand.u32 (%p28_p3), 1, %s830_s10  }
   0xd   : > { %s722_s18 = smul.u32 (%p28_p3), 24, %s834_s11 }
   0xe   : > { %s762_s19 = smul.u32 (%p28_p3), 48, %s107_s17 }
   0xf   : > { %s112_s22 = scalar_lea.vmem (%p28_p3), %s1014_s0, %s722_s18 }
  0x10   : > { %v129_v0 = vld [vmem:[%s112_s22] sm:$0xff] (%p28_p3)   ;;  %v133_v1 = vld [vmem:[%s112_s22 + $0x8] sm:$0xff] (%p28_p3)   ;;  %v137_v2 = vld [vmem:[%s112_s22 + $0x10] sm:$0xff] (%p28_p3)   ;;  %s109_s23 = scalar_lea.vmem (%p28_p3), [#allocation2], %s762_s19 }
  0x11   : > { %130 = vst [vmem:[%s109_s23] sm:$0xff] %v129_v0   ;;  %v141_v3 = vld [vmem:[%s112_s22 + $0x30] sm:$0xff]   ;;  %v145_v4 = vld [vmem:[%s112_s22 + $0x38] sm:$0xff]   ;;  %v149_v5 = vld [vmem:[%s112_s22 + $0x40] sm:$0xff]  }
  0x12   : > { %134 = vst [vmem:[%s109_s23 + $0x8] sm:$0xff] %v133_v1  }
  0x13   : > { %138 = vst [vmem:[%s109_s23 + $0x10] sm:$0xff] %v137_v2  }
  0x14   : > { %142 = vst [vmem:[%s109_s23 + $0x18] sm:$0xff] %v141_v3  }
  0x15   : > { %146 = vst [vmem:[%s109_s23 + $0x20] sm:$0xff] %v145_v4  }
  0x16   : > { %150 = vst [vmem:[%s109_s23 + $0x28] sm:$0xff] %v149_v5  }
  0x17 PF: > { %p629_p5 = scmp.ge.s32.totalorder %s834_s11, 1  ;;  %p199_p6 = scmp.lt.s32.totalorder %s834_s11, 3 }
  0x19   : > { %p200_p7 = pnand %p629_p5, %p199_p6 }
  0x1a   : > { %s206_s4 = sand.u32 (!%p200_p7), 1, %s826_s9   ;;  %p990_p8 = scmp.lt.s32.totalorder (!%p200_p7), %s624_s12, 1 }
  0x1b   : > { %203 = sbr.rel (%p200_p7) target bundleno = 261 (0x105), region = 65 }
  0x1c   : > { %s763_s14 = smul.u32 (!%p200_p7), 48, %s206_s4 }
  0x1e   : > { %s208_s23 = scalar_lea.vmem (!%p200_p7), [#allocation2], %s763_s14 }
  0x20   : > { %v714_v6 = vld [vmem:[%s1015_s1 + $0x70] sm:$0xf]  ;;  %v745_v7 = vld [vmem:[%s1015_s1 + $0x74] sm:$0xf0]  ;;  %v744_v8 = vld [vmem:[%s1015_s1 + $0x74] sm:$0xf] }
  0x21   : > { %v715_v9 = vor.u32 %v745_v7, %v714_v6  ;;  %v716_v10 = vld [vmem:[%s1015_s1 + $0x78] sm:$0xf0]  ;;  %v706_v11 = vld [vmem:[%s1015_s1 + $0x60] sm:$0xf]  ;;  %v743_v12 = vld [vmem:[%s1015_s1 + $0x64] sm:$0xf0] }
  0x22   : > { %v719_v13 = vor.u32 %v744_v8, %v716_v10  ;;  %v742_v14 = vld [vmem:[%s1015_s1 + $0x64] sm:$0xf]  ;;  %v708_v15 = vld [vmem:[%s1015_s1 + $0x68] sm:$0xf0]  ;;  %v707_v16 = vor.u32 %v743_v12, %v706_v11  ;;  %v698_v18 = vld [vmem:[%s1015_s1 + $0x50] sm:$0xf] }
  0x23   : > { %377 = vmatpush.bf16.msra.mxu0 %v715_v9  ;;  %746 = vmatpush.bf16.msra.mxu2 %v715_v9  ;;  %v711_v17 = vor.u32 %v742_v14, %v708_v15  ;;  %v741_v19 = vld [vmem:[%s1015_s1 + $0x54] sm:$0xf0]  ;;  %v740_v20 = vld [vmem:[%s1015_s1 + $0x54] sm:$0xf]  ;;  %v700_v21 = vld [vmem:[%s1015_s1 + $0x58] sm:$0xf0] }
  0x24   : > { %416 = vmatpush.bf16.msra.mxu1 %v719_v13  ;;  %754 = vmatpush.bf16.msra.mxu3 %v719_v13  ;;  %v699_v22 = vor.u32 %v741_v19, %v698_v18  ;;  %v703_v23 = vor.u32 %v740_v20, %v700_v21  ;;  %v690_v24 = vld [vmem:[%s1015_s1 + $0x40] sm:$0xf]  ;;  %v739_v25 = vld [vmem:[%s1015_s1 + $0x44] sm:$0xf0]  ;;  %v738_v26 = vld [vmem:[%s1015_s1 + $0x44] sm:$0xf] }
  0x25   : > { %v692_v27 = vld [vmem:[%s1015_s1 + $0x48] sm:$0xf0]  ;;  %v691_v28 = vor.u32 %v739_v25, %v690_v24  ;;  %v682_v30 = vld [vmem:[%s1015_s1 + $0x30] sm:$0xf]  ;;  %v737_v31 = vld [vmem:[%s1015_s1 + $0x34] sm:$0xf0] }
  0x26   : > { %v695_v29 = vor.u32 %v738_v26, %v692_v27  ;;  %v736_v32 = vld [vmem:[%s1015_s1 + $0x34] sm:$0xf]  ;;  %v684_v33 = vld [vmem:[%s1015_s1 + $0x38] sm:$0xf0]  ;;  %v683_v34 = vor.u32 %v737_v31, %v682_v30  ;;  %v674_v36 = vld [vmem:[%s1015_s1 + $0x20] sm:$0xf] }
  0x27   : > { %378 = vmatpush.bf16.msra.mxu0 %v707_v16  ;;  %747 = vmatpush.bf16.msra.mxu2 %v707_v16  ;;  %v687_v35 = vor.u32 %v736_v32, %v684_v33  ;;  %v735_v37 = vld [vmem:[%s1015_s1 + $0x24] sm:$0xf0]  ;;  %v734_v38 = vld [vmem:[%s1015_s1 + $0x24] sm:$0xf]  ;;  %v676_v39 = vld [vmem:[%s1015_s1 + $0x28] sm:$0xf0] }
  0x28   : > { %417 = vmatpush.bf16.msra.mxu1 %v711_v17  ;;  %755 = vmatpush.bf16.msra.mxu3 %v711_v17  ;;  %v675_v40 = vor.u32 %v735_v37, %v674_v36  ;;  %v679_v41 = vor.u32 %v734_v38, %v676_v39  ;;  %v666_v42 = vld [vmem:[%s1015_s1 + $0x10] sm:$0xf]  ;;  %v733_v43 = vld [vmem:[%s1015_s1 + $0x14] sm:$0xf0]  ;;  %v732_v44 = vld [vmem:[%s1015_s1 + $0x14] sm:$0xf] }
  0x29   : > { %v668_v45 = vld [vmem:[%s1015_s1 + $0x18] sm:$0xf0]  ;;  %v667_v46 = vor.u32 %v733_v43, %v666_v42  ;;  %v658_v48 = vld [vmem:[%s1015_s1] sm:$0xf]  ;;  %v731_v49 = vld [vmem:[%s1015_s1 + $0x4] sm:$0xf0] }
  0x2a   : > { %v671_v47 = vor.u32 %v732_v44, %v668_v45  ;;  %v730_v50 = vld [vmem:[%s1015_s1 + $0x4] sm:$0xf]  ;;  %v660_v51 = vld [vmem:[%s1015_s1 + $0x8] sm:$0xf0]  ;;  %v659_v52 = vor.u32 %v731_v49, %v658_v48  ;;  %s1022_s12 = smov (!%p990_p8, %s624_s12), 1 }
  0x2b   : > { %379 = vmatpush.bf16.msra.mxu0 %v699_v22  ;;  %748 = vmatpush.bf16.msra.mxu2 %v699_v22  ;;  %v663_v53 = vor.u32 %v730_v50, %v660_v51  ;;  %v724_v54 = vld [vmem:[%s208_s23] sm:$0xff]  ;;  %v727_v55 = vld [vmem:[%s208_s23 + $0x18] sm:$0xff]  ;;  %v725_v56 = vld [vmem:[%s208_s23 + $0x8] sm:$0xff]  ;;  %s723_s11 = sshll.u32 %s1022_s12, 4 }
  0x2c   : > { %418 = vmatpush.bf16.msra.mxu1 %v703_v23  ;;  %756 = vmatpush.bf16.msra.mxu3 %v703_v23  ;;  %v728_v57 = vld [vmem:[%s208_s23 + $0x20] sm:$0xff]  ;;  %v726_v58 = vld [vmem:[%s208_s23 + $0x10] sm:$0xff]  ;;  %v729_v59 = vld [vmem:[%s208_s23 + $0x28] sm:$0xff]  ;;  %s232_s27 = scalar_lea.vmem %s1016_s2, %s723_s11 }
  0x2f   : > { %380 = vmatpush.bf16.msra.mxu0 %v691_v28  ;;  %749 = vmatpush.bf16.msra.mxu2 %v691_v28 }
  0x30   : > { %419 = vmatpush.bf16.msra.mxu1 %v695_v29  ;;  %757 = vmatpush.bf16.msra.mxu3 %v695_v29 }
  0x33   : > { %381 = vmatpush.bf16.msra.mxu0 %v683_v34  ;;  %750 = vmatpush.bf16.msra.mxu2 %v683_v34 }
  0x34   : > { %420 = vmatpush.bf16.msra.mxu1 %v687_v35  ;;  %758 = vmatpush.bf16.msra.mxu3 %v687_v35 }
  0x37   : > { %382 = vmatpush.bf16.msra.mxu0 %v675_v40  ;;  %751 = vmatpush.bf16.msra.mxu2 %v675_v40 }
  0x38   : > { %421 = vmatpush.bf16.msra.mxu1 %v679_v41  ;;  %759 = vmatpush.bf16.msra.mxu3 %v679_v41 }
  0x3b   : > { %383 = vmatpush.bf16.msra.mxu0 %v667_v46  ;;  %752 = vmatpush.bf16.msra.mxu2 %v667_v46 }
  0x3c   : > { %422 = vmatpush.bf16.msra.mxu1 %v671_v47  ;;  %760 = vmatpush.bf16.msra.mxu3 %v671_v47 }
  0x3f   : > { %384 = vmatpush.bf16.msra.mxu0 %v659_v52  ;;  %753 = vmatpush.bf16.msra.mxu2 %v659_v52 }
  0x40   : > { %423 = vmatpush.bf16.msra.mxu1 %v663_v53  ;;  %761 = vmatpush.bf16.msra.mxu3 %v663_v53 }
  0x42   : > { %385 = vmatmul.bf16.vlgmr.msra.gmra.mxu0 %v724_v54  ;;  %400 = vmatmul.bf16.vlgmr.msra.gmra.mxu2 %v727_v55 }
  0x43   : > { %424 = vmatmul.bf16.vlgmr.msra.gmra.mxu1 %v724_v54  ;;  %439 = vmatmul.bf16.vlgmr.msra.gmra.mxu3 %v727_v55 }
  0x52   : > { %390 = vmatmul.bf16.gmra.mxu0 %v725_v56  ;;  %405 = vmatmul.bf16.gmra.mxu2 %v728_v57 }
  0x53   : > { %429 = vmatmul.bf16.gmra.mxu1 %v725_v56  ;;  %444 = vmatmul.bf16.gmra.mxu3 %v728_v57 }
  0x62   : > { %395 = vmatmul.bf16.gmra.mxu0 %v726_v58  ;;  %410 = vmatmul.bf16.gmra.mxu2 %v729_v59 }
  0x63   : > { %434 = vmatmul.bf16.gmra.mxu1 %v726_v58  ;;  %449 = vmatmul.bf16.gmra.mxu3 %v729_v59 }
  0xbf   : > { %v386_v60 = vpop.f32.mrf.mxu0 }
  0xc0   : > { %v425_v61 = vpop.f32.mrf.mxu1  ;;  %v455_v6 = vmul.f32 %v386_v60, %v386_v60 }
  0xc1   : > { %v467_v7 = vmul.f32 %v425_v61, %v425_v61 }
  0xc3   : > { %v984_v16 = vadd.f32 %v467_v7, %v455_v6 }
  0xc5   : > { %v401_v62 = vpop.f32.mrf.mxu2  ;;  %v503_v25 = vadd.f32 1e-07, %v984_v16 }
  0xc6   : > { %v440_v63 = vpop.f32.mrf.mxu3  ;;  %v461_v10 = vmul.f32 %v401_v62, %v401_v62 }
  0xc7   : > { %v388_v0 = vpop.f32.mrf.mxu0  ;;  %v473_v11 = vmul.f32 %v440_v63, %v440_v63  ;;  %788 = vlog2.f32 %v503_v25 }
  0xc8   : > { %v427_v1 = vpop.f32.mrf.mxu1  ;;  %v456_v13 = vmul.f32 %v388_v0, %v388_v0 }
  0xc9   : > { %v468_v14 = vmul.f32 %v427_v1, %v427_v1  ;;  %v485_v21 = vadd.f32 %v473_v11, %v461_v10 }
  0xcb   : > { %v480_v24 = vadd.f32 %v468_v14, %v456_v13  ;;  %v521_v33 = vadd.f32 1e-07, %v485_v21  ;;  %v491_v57 = vsub.f32 %v485_v21, %v984_v16 }
  0xcd   : > { %v403_v2 = vpop.f32.mrf.mxu2  ;;  %v504_v37 = vadd.f32 1e-07, %v480_v24  ;;  %790 = vlog2.f32 %v521_v33  ;;  %v789_v56 = vpop.eup %788 }
  0xce   : > { %v442_v3 = vpop.f32.mrf.mxu3  ;;  %v462_v17 = vmul.f32 %v403_v2, %v403_v2 }
  0xcf   : > { %v391_v4 = vpop.f32.mrf.mxu0  ;;  %v474_v18 = vmul.f32 %v442_v3, %v442_v3  ;;  %792 = vlog2.f32 %v504_v37 }
  0xd0   : > { %v430_v5 = vpop.f32.mrf.mxu1  ;;  %v457_v19 = vmul.f32 %v391_v4, %v391_v4 }
  0xd1   : > { %v469_v20 = vmul.f32 %v430_v5, %v430_v5  ;;  %v486_v26 = vadd.f32 %v474_v18, %v462_v17 }
  0xd3   : > { %v481_v28 = vadd.f32 %v469_v20, %v457_v19  ;;  %v522_v40 = vadd.f32 1e-07, %v486_v26  ;;  %v492_v49 = vsub.f32 %v486_v26, %v480_v24  ;;  %v791_v60 = vpop.eup %790 }
  0xd4   : > { %v528_v13 = vmul.f32 0.6931472, %v791_v60 }
  0xd5   : > { %v406_v8 = vpop.f32.mrf.mxu2  ;;  %v505_v43 = vadd.f32 1e-07, %v481_v28  ;;  %794 = vlog2.f32 %v522_v40  ;;  %v793_v0 = vpop.eup %792  ;;  %v498_v1 = vand.u32 2147483647, %v492_v49 }
  0xd6   : > { %v445_v9 = vpop.f32.mrf.mxu3  ;;  %v463_v22 = vmul.f32 %v406_v8, %v406_v8  ;;  %v497_v8 = vand.u32 2147483647, %v491_v57 }
  0xd7   : > { %v393_v12 = vpop.f32.mrf.mxu0  ;;  %v475_v23 = vmul.f32 %v445_v9, %v445_v9  ;;  %796 = vlog2.f32 %v505_v43 }
  0xd8   : > { %v432_v15 = vpop.f32.mrf.mxu1  ;;  %v458_v29 = vmul.f32 %v393_v12, %v393_v12  ;;  %v510_v12 = vmul.f32 0.6931472, %v789_v56  ;;  %v551_v18 = vadd.f32 %v498_v1, %v497_v8 }
  0xd9   : > { %v470_v30 = vmul.f32 %v432_v15, %v432_v15  ;;  %v487_v34 = vadd.f32 %v475_v23, %v463_v22  ;;  %v512_v23 = vmul.f32 0.6931472, %v793_v0 }
  0xdb   : > { %v482_v44 = vadd.f32 %v470_v30, %v458_v29  ;;  %v523_v45 = vadd.f32 1e-07, %v487_v34  ;;  %v493_v61 = vsub.f32 %v487_v34, %v481_v28  ;;  %v795_v2 = vpop.eup %794  ;;  %v539_v30 = vsub.f32 %v510_v12, %v528_v13 }
  0xdc   : > { %v530_v14 = vmul.f32 0.6931472, %v795_v2 }
  0xdd   : > { %v408_v27 = vpop.f32.mrf.mxu2  ;;  %v506_v50 = vadd.f32 1e-07, %v482_v44  ;;  %798 = vlog2.f32 %v523_v45  ;;  %v797_v6 = vpop.eup %796  ;;  %v499_v9 = vand.u32 2147483647, %v493_v61 }
  0xde   : > { %v464_v31 = vmul.f32 %v408_v27, %v408_v27  ;;  %v447_v32 = vpop.f32.mrf.mxu3  ;;  %v514_v24 = vmul.f32 0.6931472, %v797_v6 }
  0xdf   : > { %v476_v35 = vmul.f32 %v447_v32, %v447_v32  ;;  %v396_v36 = vpop.f32.mrf.mxu0  ;;  %v552_v27 = vadd.f32 %v551_v18, %v499_v9 }
  0xe0   : > { %v459_v38 = vmul.f32 %v396_v36, %v396_v36  ;;  %v435_v39 = vpop.f32.mrf.mxu1 }
  0xe1   : > { %v488_v41 = vadd.f32 %v476_v35, %v464_v31  ;;  %v471_v42 = vmul.f32 %v435_v39, %v435_v39  ;;  %v540_v31 = vsub.f32 %v512_v23, %v530_v14 }
  0xe3   : > { %v483_v46 = vadd.f32 %v471_v42, %v459_v38  ;;  %v524_v47 = vadd.f32 1e-07, %v488_v41  ;;  %v494_v3 = vsub.f32 %v488_v41, %v482_v44  ;;  %v799_v7 = vpop.eup %798  ;;  %v546_v43 = vand.u32 2147483647, %v540_v31 }
  0xe4   : > { %v532_v25 = vmul.f32 0.6931472, %v799_v7 }
  0xe5   : > { %v411_v48 = vpop.f32.mrf.mxu2  ;;  %v507_v53 = vadd.f32 1e-07, %v483_v46  ;;  %800 = vlog2.f32 %v524_v47  ;;  %v500_v19 = vand.u32 2147483647, %v494_v3 }
  0xe6   : > { %v465_v51 = vmul.f32 %v411_v48, %v411_v48  ;;  %v450_v52 = vpop.f32.mrf.mxu3  ;;  %802 = vlog2.f32 %v506_v50  ;;  %v541_v37 = vsub.f32 %v514_v24, %v532_v25 }
  0xe7   : > { %v477_v54 = vmul.f32 %v450_v52, %v450_v52  ;;  %v398_v55 = vpop.f32.mrf.mxu0  ;;  %804 = vlog2.f32 %v507_v53  ;;  %v553_v34 = vadd.f32 %v552_v27, %v500_v19 }
  0xe8   : > { %v460_v58 = vmul.f32 %v398_v55, %v398_v55  ;;  %v437_v59 = vpop.f32.mrf.mxu1  ;;  %v547_v47 = vand.u32 2147483647, %v541_v37 }
  0xe9   : > { %v489_v62 = vadd.f32 %v477_v54, %v465_v51  ;;  %v472_v63 = vmul.f32 %v437_v59, %v437_v59 }
  0xeb   : > { %v525_v4 = vadd.f32 1e-07, %v489_v62  ;;  %v484_v5 = vadd.f32 %v472_v63, %v460_v58  ;;  %v495_v10 = vsub.f32 %v489_v62, %v483_v46  ;;  %v801_v17 = vpop.eup %800  ;;  %v545_v46 = vand.u32 2147483647, %v539_v30 }
  0xec   : > { %v803_v22 = vpop.eup %802  ;;  %v534_v32 = vmul.f32 0.6931472, %v801_v17 }
  0xed   : > { %806 = vlog2.f32 %v525_v4  ;;  %v413_v11 = vpop.f32.mrf.mxu2  ;;  %v508_v20 = vadd.f32 1e-07, %v484_v5  ;;  %v805_v26 = vpop.eup %804  ;;  %v501_v28 = vand.u32 2147483647, %v495_v10  ;;  %v516_v38 = vmul.f32 0.6931472, %v803_v22 }
  0xee   : > { %v466_v15 = vmul.f32 %v413_v11, %v413_v11  ;;  %v452_v16 = vpop.f32.mrf.mxu3  ;;  %v518_v39 = vmul.f32 0.6931472, %v805_v26  ;;  %v557_v50 = vadd.f32 %v546_v43, %v545_v46 }
  0xef   : > { %v478_v21 = vmul.f32 %v452_v16, %v452_v16  ;;  %808 = vlog2.f32 %v508_v20  ;;  %v554_v41 = vadd.f32 %v553_v34, %v501_v28  ;;  %v542_v44 = vsub.f32 %v516_v38, %v534_v32 }
  0xf0   : > { %v558_v53 = vadd.f32 %v557_v50, %v547_v47 }
  0xf1   : > { %v490_v29 = vadd.f32 %v478_v21, %v466_v15  ;;  %v548_v51 = vand.u32 2147483647, %v542_v44 }
  0xf3   : > { %v807_v33 = vpop.eup %806  ;;  %v496_v35 = vsub.f32 %v490_v29, %v484_v5  ;;  %v526_v36 = vadd.f32 1e-07, %v490_v29  ;;  %v559_v57 = vadd.f32 %v558_v53, %v548_v51 }
  0xf4   : > { %v536_v40 = vmul.f32 0.6931472, %v807_v33 }
  0xf5   : > { %v502_v42 = vand.u32 2147483647, %v496_v35  ;;  %810 = vlog2.f32 %v526_v36  ;;  %v809_v49 = vpop.eup %808 }
  0xf6   : > { %v543_v48 = vsub.f32 %v518_v39, %v536_v40  ;;  %v520_v55 = vmul.f32 0.6931472, %v809_v49 }
  0xf7   : > { %v555_v45 = vadd.f32 %v554_v41, %v502_v42 }
  0xf8   : > { %v549_v54 = vand.u32 2147483647, %v543_v48 }
  0xf9   : > { %556 = vst [vmem:[%s232_s27] sm:$0xff] %v555_v45 }
  0xfa   : > { %v560_v59 = vadd.f32 %v559_v57, %v549_v54 }
  0xfb   : > { %v811_v52 = vpop.eup %810 }
  0xfc   : > { %v538_v56 = vmul.f32 0.6931472, %v811_v52 }
  0xfe   : > { %v544_v58 = vsub.f32 %v520_v55, %v538_v56 }
 0x100   : > { %v550_v60 = vand.u32 2147483647, %v544_v58 }
 0x102   : > { %v561_v61 = vadd.f32 %v560_v59, %v550_v60 }
 0x104   : > { %562 = vst [vmem:[%s232_s27 + $0x8] sm:$0xff] %v561_v61 }
 0x105 PF: > { %p9_p9 = scmp.ge.s32.totalorder %s868_s13, 4   ;;  %s1018_s9 = smov %s830_s10 }
 0x106   : > { %s1019_s10 = smov %s877_s16  ;;  %s1020_s11 = smov %s868_s13 }
 0x107   :  { %11 = sbr.rel (!%p9_p9) target bundleno = 2 (0x2), region = 104 }

</bundles_post_ra>
